<compile_context>
chip_gen: v7x
topology: tpu7x:2x2x1
jax: 0.10.0
libtpu: 0.0.40
codegen_flags: <defaults>
</compile_context>

<pallas_src>
import jax
import jax.numpy as jnp
from jax import lax
from jax.experimental import pallas as pl
from jax.experimental.pallas import tpu as pltpu


def _make_resblock_kernel(has_downsample):
    def kernel(*refs):
        if has_downsample:
            (x_ref, w1_ref, b1_ref, w2_ref, b2_ref,
             wd_ref, bd_ref, o_ref, xpad_ref) = refs
        else:
            x_ref, w1_ref, b1_ref, w2_ref, b2_ref, o_ref, xpad_ref = refs

        H = x_ref.shape[1]
        W = x_ref.shape[2]
        cin = x_ref.shape[3]

        # Raw input tile (kept in f32 for the residual path).
        x_val = x_ref[0]                                   # (H, W, Cin) f32

        # ---- in-kernel halo pad: zero-filled VMEM scratch, relu'd interior.
        # relu(0) == 0, so padding commutes with the leading relu.
        xpad_ref[...] = jnp.zeros_like(xpad_ref)
        xpad_ref[1:H + 1, 1:W + 1, :] = jnp.maximum(x_val, 0.0)
        xp = xpad_ref[...]                                 # (H+2, W+2, Cin) f32

        # ---- conv1 (3x3, stride 1, pad 1): single matmul with K = 9*Cin.
        # Concatenate the 9 shifted taps along the channel axis (matches the
        # wrapper-side w1.reshape(9*Cin, Ch) ordering: dh-major, dw, then c).
        pieces = [xp[dh:dh + H, dw:dw + W, :]
                  for dh in range(3) for dw in range(3)]
        slab = jnp.concatenate(pieces, axis=-1)            # (H, W, 9*Cin) f32
        slab = slab.astype(jnp.bfloat16).reshape(H * W, 9 * cin)

        y = jnp.dot(slab, w1_ref[...],
                    preferred_element_type=jnp.float32)    # (H*W, Ch) f32
        h = jnp.maximum(y + b1_ref[0], 0.0).astype(jnp.bfloat16)

        # ---- conv2 (1x1): plain matmul.
        out = jnp.dot(h, w2_ref[...],
                      preferred_element_type=jnp.float32) + b2_ref[0]

        # ---- residual path (un-relu'd input).
        x_flat = x_val.reshape(H * W, cin)                 # (H*W, Cin) f32
        if has_downsample:
            identity = jnp.dot(x_flat.astype(jnp.bfloat16), wd_ref[...],
                               preferred_element_type=jnp.float32) + bd_ref[0]
        else:
            identity = x_flat

        o_ref[0] = (out + identity).astype(o_ref.dtype)    # (H*W, Cout)

    return kernel


def resblock_forward(x_nchw, w1, b1, w2, b2, wd=None, bd=None):
    """x_nchw: (B, Cin, H, W) f32.
    w1: (3, 3, Cin, Ch)   b1: (1, Ch)       -- conv1 (3x3, s1, p1), HWIO layout
    w2: (Ch, Cout)        b2: (1, Cout)     -- conv2 (1x1)
    wd: (Cin, Cout)       bd: (1, Cout)     -- downsample (1x1), or None
    returns (B, Cout, H, W) f32.
    """
    B, Cin, H, W = x_nchw.shape
    Ch = w1.shape[3]
    Cout = w2.shape[1]
    has_downsample = wd is not None
    if not has_downsample:
        assert Cin == Cout, (
            "identity skip requires nin == nout; pass a downsample conv (wd, bd)")

    x = jnp.transpose(x_nchw, (0, 2, 3, 1)).astype(jnp.float32)     # NHWC

    # Weights: stack the 9 conv1 taps into one deep-K matrix, cast MXU
    # operands to bf16 (accumulation stays f32 inside the kernel).
    w1s = w1.reshape(9 * Cin, Ch).astype(jnp.bfloat16)
    w2b = w2.astype(jnp.bfloat16)
    b1f = b1.astype(jnp.float32)
    b2f = b2.astype(jnp.float32)

    in_specs = [
        pl.BlockSpec((1, H, W, Cin), lambda b: (b, 0, 0, 0)),
        pl.BlockSpec((9 * Cin, Ch), lambda b: (0, 0)),
        pl.BlockSpec((1, Ch), lambda b: (0, 0)),
        pl.BlockSpec((Ch, Cout), lambda b: (0, 0)),
        pl.BlockSpec((1, Cout), lambda b: (0, 0)),
    ]
    args = [x, w1s, b1f, w2b, b2f]
    if has_downsample:
        in_specs += [
            pl.BlockSpec((Cin, Cout), lambda b: (0, 0)),
            pl.BlockSpec((1, Cout), lambda b: (0, 0)),
        ]
        args += [wd.astype(jnp.bfloat16), bd.astype(jnp.float32)]

    # Explicit VMEM budget from the actual buffer sizes (double-buffered
    # tiles + weights + padded scratch + in-kernel temporaries), with margin.
    f32b, bf16b = 4, 2
    tile_in = H * W * Cin * f32b
    tile_out = H * W * Cout * f32b
    weight_b = (9 * Cin * Ch + Ch * Cout + Cin * Cout) * bf16b + (Ch + 2 * Cout) * f32b
    scratch_b = (H + 2) * (W + 2) * Cin * f32b
    temps_b = H * W * (9 * Cin * (f32b + bf16b)      # concat slab f32 + bf16
                       + Ch * (f32b + bf16b)         # conv1 out f32 + bf16
                       + 2 * Cout * f32b)            # conv2 out + residual sum
    need = 2 * (tile_in + tile_out + weight_b) + scratch_b + temps_b
    vmem_limit = int(min(max(4 * need, 16 * 1024 * 1024), 64 * 1024 * 1024))

    out_flat = pl.pallas_call(
        _make_resblock_kernel(has_downsample),
        out_shape=jax.ShapeDtypeStruct((B, H * W, Cout), jnp.float32),
        grid_spec=pltpu.PrefetchScalarGridSpec(
            num_scalar_prefetch=0,
            grid=(B,),
            in_specs=in_specs,
            out_specs=pl.BlockSpec((1, H * W, Cout), lambda b: (b, 0, 0)),
            scratch_shapes=[pltpu.VMEM((H + 2, W + 2, Cin), jnp.float32)],
        ),
        compiler_params=pltpu.CompilerParams(
            dimension_semantics=("parallel",),
            vmem_limit_bytes=vmem_limit),
    )(*args)

    out_nhwc = out_flat.reshape(B, H, W, Cout)                      # free reshape
    return jnp.transpose(out_nhwc, (0, 3, 1, 2))                    # NCHW


def resblock_reference(x_nchw, w1, b1, w2, b2, wd=None, bd=None):
    """Pure-JAX f32 reference (matches PyTorch semantics, stride=1)."""
    x = jnp.transpose(x_nchw, (0, 2, 3, 1)).astype(jnp.float32)
    xr = jnp.maximum(x, 0.0)
    y = lax.conv_general_dilated(
        xr, w1, window_strides=(1, 1), padding="SAME",
        dimension_numbers=("NHWC", "HWIO", "NHWC")) + b1[0]
    y = jnp.maximum(y, 0.0)
    y = jnp.einsum("nhwc,cd->nhwd", y, w2) + b2[0]
    if wd is not None:
        identity = jnp.einsum("nhwc,cd->nhwd", x, wd) + bd[0]
    else:
        identity = x
    y = y + identity
    return jnp.transpose(y, (0, 3, 1, 2))


def _init_params(key, nin, nhidden, nout, with_downsample):
    ks = jax.random.split(key, 6)
    w1 = 0.1 * jax.random.normal(ks[0], (3, 3, nin, nhidden), jnp.float32)
    b1 = 0.1 * jax.random.normal(ks[1], (1, nhidden), jnp.float32)
    w2 = 0.1 * jax.random.normal(ks[2], (nhidden, nout), jnp.float32)
    b2 = 0.1 * jax.random.normal(ks[3], (1, nout), jnp.float32)
    if with_downsample:
        wd = 0.1 * jax.random.normal(ks[4], (nin, nout), jnp.float32)
        bd = 0.1 * jax.random.normal(ks[5], (1, nout), jnp.float32)
        return w1, b1, w2, b2, wd, bd
    return w1, b1, w2, b2, None, None


if __name__ == "__main__":
    key = jax.random.PRNGKey(0)
    kx, kp1, kp2 = jax.random.split(key, 3)

    B, H, W = 2, 16, 16

    # Kernel uses bf16 MXU operands with f32 accumulation -> compare against
    # the f32 reference with a correspondingly loosened tolerance.
    ATOL = RTOL = 2e-2

    # Case 1: nin == nout, stride == 1  ->  downsample is None (identity skip)
    nin, nhidden, nout = 4, 8, 4
    x = jax.random.normal(kx, (B, nin, H, W), jnp.float32)
    w1, b1, w2, b2, _, _ = _init_params(kp1, nin, nhidden, nout, False)
    out = jax.block_until_ready(resblock_forward(x, w1, b1, w2, b2))
    ref = resblock_reference(x, w1, b1, w2, b2)
    assert out.shape == (B, nout, H, W)
    assert jnp.allclose(out, ref, atol=ATOL, rtol=RTOL), "mismatch (no downsample)"

    # Case 2: nin != nout  ->  1x1 downsample conv on the identity path
    nin2, nhidden2, nout2 = 4, 8, 6
    x2 = jax.random.normal(kx, (B, nin2, H, W), jnp.float32)
    w1d, b1d, w2d, b2d, wd, bd = _init_params(kp2, nin2, nhidden2, nout2, True)
    out2 = jax.block_until_ready(
        resblock_forward(x2, w1d, b1d, w2d, b2d, wd, bd))
    ref2 = resblock_reference(x2, w1d, b1d, w2d, b2d, wd, bd)
    assert out2.shape == (B, nout2, H, W)
    assert jnp.allclose(out2, ref2, atol=ATOL, rtol=RTOL), "mismatch (downsample)"

    print("KERNEL_OK")
</pallas_src>

<mosaic_0001>
module attributes {stable_mosaic.version = 11 : i64} {
  func.func @kernel(%arg0: i32, %arg1: memref<1x16x16x4xf32, #tpu.memory_space<vmem>>, %arg2: memref<36x8xbf16, #tpu.memory_space<vmem>>, %arg3: memref<1x8xf32, #tpu.memory_space<vmem>>, %arg4: memref<8x4xbf16, #tpu.memory_space<vmem>>, %arg5: memref<1x4xf32, #tpu.memory_space<vmem>>, %arg6: memref<1x256x4xf32, #tpu.memory_space<vmem>>, %arg7: memref<18x18x4xf32, #tpu.memory_space<vmem>>) attributes {dimension_semantics = [#tpu.dimension_semantics<parallel>], iteration_bounds = array<i64: 2>, scalar_prefetch = 0 : i64, scratch_operands = 1 : i64, tpu.core_type = #tpu.core_type<tc>, window_params = [{transform_indices = @transform_0, window_bounds = array<i64: 1, 16, 16, 4>}, {pipeline_mode = #tpu.pipeline_mode<synchronous>, transform_indices = @transform_1, window_bounds = array<i64: 36, 8>}, {pipeline_mode = #tpu.pipeline_mode<synchronous>, transform_indices = @transform_2, window_bounds = array<i64: 1, 8>}, {pipeline_mode = #tpu.pipeline_mode<synchronous>, transform_indices = @transform_3, window_bounds = array<i64: 8, 4>}, {pipeline_mode = #tpu.pipeline_mode<synchronous>, transform_indices = @transform_4, window_bounds = array<i64: 1, 4>}, {transform_indices = @transform_5, window_bounds = array<i64: 1, 256, 4>}]} {
    %c0 = arith.constant 0 : index
    %c0_0 = arith.constant 0 : index
    %c0_1 = arith.constant 0 : index
    %c0_2 = arith.constant 0 : index
    %0 = vector.load %arg1[%c0, %c0_0, %c0_1, %c0_2] : memref<1x16x16x4xf32, #tpu.memory_space<vmem>>, vector<1x16x16x4xf32>
    %1 = vector.shape_cast %0 : vector<1x16x16x4xf32> to vector<16x16x4xf32>
    %cst = arith.constant 0.000000e+00 : f32
    %2 = vector.broadcast %cst : f32 to vector<18x18x4xf32>
    %c0_3 = arith.constant 0 : index
    %c0_4 = arith.constant 0 : index
    %c0_5 = arith.constant 0 : index
    %3 = vector.load %arg7[%c0_3, %c0_4, %c0_5] : memref<18x18x4xf32, #tpu.memory_space<vmem>>, vector<18x18x4xf32>
    tpu.vector_store %arg7[%c0_3, %c0_4, %c0_5], %2 {strides = array<i32>} : memref<18x18x4xf32, #tpu.memory_space<vmem>>, vector<18x18x4xf32>,
    %cst_6 = arith.constant 0.000000e+00 : f32
    %4 = vector.broadcast %cst_6 : f32 to vector<16x16x4xf32>
    %5 = arith.maximumf %1, %4 : vector<16x16x4xf32>
    %c1 = arith.constant 1 : index
    %c1_7 = arith.constant 1 : index
    %c0_8 = arith.constant 0 : index
    %6 = vector.load %arg7[%c1, %c1_7, %c0_8] : memref<18x18x4xf32, #tpu.memory_space<vmem>>, vector<16x16x4xf32>
    tpu.vector_store %arg7[%c1, %c1_7, %c0_8], %5 {strides = array<i32>} : memref<18x18x4xf32, #tpu.memory_space<vmem>>, vector<16x16x4xf32>,
    %c0_9 = arith.constant 0 : index
    %c0_10 = arith.constant 0 : index
    %c0_11 = arith.constant 0 : index
    %7 = vector.load %arg7[%c0_9, %c0_10, %c0_11] : memref<18x18x4xf32, #tpu.memory_space<vmem>>, vector<18x18x4xf32>
    %8 = vector.extract_strided_slice %7 {offsets = [0, 0, 0], sizes = [16, 16, 4], strides = [1, 1, 1]} : vector<18x18x4xf32> to vector<16x16x4xf32>
    %9 = vector.extract_strided_slice %7 {offsets = [0, 1, 0], sizes = [16, 16, 4], strides = [1, 1, 1]} : vector<18x18x4xf32> to vector<16x16x4xf32>
    %10 = vector.extract_strided_slice %7 {offsets = [0, 2, 0], sizes = [16, 16, 4], strides = [1, 1, 1]} : vector<18x18x4xf32> to vector<16x16x4xf32>
    %11 = vector.extract_strided_slice %7 {offsets = [1, 0, 0], sizes = [16, 16, 4], strides = [1, 1, 1]} : vector<18x18x4xf32> to vector<16x16x4xf32>
    %12 = vector.extract_strided_slice %7 {offsets = [1, 1, 0], sizes = [16, 16, 4], strides = [1, 1, 1]} : vector<18x18x4xf32> to vector<16x16x4xf32>
    %13 = vector.extract_strided_slice %7 {offsets = [1, 2, 0], sizes = [16, 16, 4], strides = [1, 1, 1]} : vector<18x18x4xf32> to vector<16x16x4xf32>
    %14 = vector.extract_strided_slice %7 {offsets = [2, 0, 0], sizes = [16, 16, 4], strides = [1, 1, 1]} : vector<18x18x4xf32> to vector<16x16x4xf32>
    %15 = vector.extract_strided_slice %7 {offsets = [2, 1, 0], sizes = [16, 16, 4], strides = [1, 1, 1]} : vector<18x18x4xf32> to vector<16x16x4xf32>
    %16 = vector.extract_strided_slice %7 {offsets = [2, 2, 0], sizes = [16, 16, 4], strides = [1, 1, 1]} : vector<18x18x4xf32> to vector<16x16x4xf32>
    %17 = tpu.concatenate %8, %9, %10, %11, %12, %13, %14, %15, %16 in 2 : vector<16x16x4xf32>, vector<16x16x4xf32>, vector<16x16x4xf32>, vector<16x16x4xf32>, vector<16x16x4xf32>, vector<16x16x4xf32>, vector<16x16x4xf32>, vector<16x16x4xf32>, vector<16x16x4xf32> -> vector<16x16x36xf32>
    %18 = arith.truncf %17 : vector<16x16x36xf32> to vector<16x16x36xbf16>
    %19 = vector.shape_cast %18 : vector<16x16x36xbf16> to vector<256x36xbf16>
    %c0_12 = arith.constant 0 : index
    %c0_13 = arith.constant 0 : index
    %20 = vector.load %arg2[%c0_12, %c0_13] : memref<36x8xbf16, #tpu.memory_space<vmem>>, vector<36x8xbf16>
    %cst_14 = arith.constant dense<0.000000e+00> : vector<256x8xf32>
    %21 = tpu.matmul %19, %20, %cst_14 {dimension_numbers = #tpu.dot_dimension_numbers<[1], [0], [0], [1], [0, 0, 1, 1], [], []>} : vector<256x36xbf16>, vector<36x8xbf16>, vector<256x8xf32> -> vector<256x8xf32>
    %c0_15 = arith.constant 0 : index
    %c0_16 = arith.constant 0 : index
    %22 = vector.load %arg3[%c0_15, %c0_16] : memref<1x8xf32, #tpu.memory_space<vmem>>, vector<1x8xf32>
    %23 = vector.shape_cast %22 : vector<1x8xf32> to vector<8xf32>
    %24 = vector.shape_cast %23 : vector<8xf32> to vector<1x8xf32>
    %25 = vector.broadcast %24 : vector<1x8xf32> to vector<256x8xf32>
    %26 = arith.addf %21, %25 : vector<256x8xf32>
    %cst_17 = arith.constant 0.000000e+00 : f32
    %27 = vector.broadcast %cst_17 : f32 to vector<256x8xf32>
    %28 = arith.maximumf %26, %27 : vector<256x8xf32>
    %29 = arith.truncf %28 : vector<256x8xf32> to vector<256x8xbf16>
    %c0_18 = arith.constant 0 : index
    %c0_19 = arith.constant 0 : index
    %30 = vector.load %arg4[%c0_18, %c0_19] : memref<8x4xbf16, #tpu.memory_space<vmem>>, vector<8x4xbf16>
    %cst_20 = arith.constant dense<0.000000e+00> : vector<256x4xf32>
    %31 = tpu.matmul %29, %30, %cst_20 {dimension_numbers = #tpu.dot_dimension_numbers<[1], [0], [0], [1], [0, 0, 1, 1], [], []>} : vector<256x8xbf16>, vector<8x4xbf16>, vector<256x4xf32> -> vector<256x4xf32>
    %c0_21 = arith.constant 0 : index
    %c0_22 = arith.constant 0 : index
    %32 = vector.load %arg5[%c0_21, %c0_22] : memref<1x4xf32, #tpu.memory_space<vmem>>, vector<1x4xf32>
    %33 = vector.shape_cast %32 : vector<1x4xf32> to vector<4xf32>
    %34 = vector.shape_cast %33 : vector<4xf32> to vector<1x4xf32>
    %35 = vector.broadcast %34 : vector<1x4xf32> to vector<256x4xf32>
    %36 = arith.addf %31, %35 : vector<256x4xf32>
    %37 = vector.shape_cast %1 : vector<16x16x4xf32> to vector<256x4xf32>
    %38 = arith.addf %36, %37 : vector<256x4xf32>
    %c0_23 = arith.constant 0 : index
    %c0_24 = arith.constant 0 : index
    %c0_25 = arith.constant 0 : index
    %39 = vector.load %arg6[%c0_23, %c0_24, %c0_25] : memref<1x256x4xf32, #tpu.memory_space<vmem>>, vector<1x256x4xf32>
    %40 = vector.shape_cast %39 : vector<1x256x4xf32> to vector<256x4xf32>
    %41 = vector.shape_cast %38 : vector<256x4xf32> to vector<1x256x4xf32>
    tpu.vector_store %arg6[%c0_23, %c0_24, %c0_25], %41 {strides = array<i32>} : memref<1x256x4xf32, #tpu.memory_space<vmem>>, vector<1x256x4xf32>,
    return
  }
  func.func @transform_0(%arg0: i32) -> (i32, i32, i32, i32) {
    %c0_i32 = arith.constant 0 : i32
    %c0_i32_0 = arith.constant 0 : i32
    %c0_i32_1 = arith.constant 0 : i32
    %c0_i32_2 = arith.constant 0 : i32
    return %arg0, %c0_i32, %c0_i32_0, %c0_i32_1 : i32, i32, i32, i32
  }
  func.func @transform_1(%arg0: i32) -> (i32, i32) {
    %c0_i32 = arith.constant 0 : i32
    %c0_i32_0 = arith.constant 0 : i32
    %c0_i32_1 = arith.constant 0 : i32
    return %c0_i32, %c0_i32_0 : i32, i32
  }
  func.func @transform_2(%arg0: i32) -> (i32, i32) {
    %c0_i32 = arith.constant 0 : i32
    %c0_i32_0 = arith.constant 0 : i32
    %c0_i32_1 = arith.constant 0 : i32
    return %c0_i32, %c0_i32_0 : i32, i32
  }
  func.func @transform_3(%arg0: i32) -> (i32, i32) {
    %c0_i32 = arith.constant 0 : i32
    %c0_i32_0 = arith.constant 0 : i32
    %c0_i32_1 = arith.constant 0 : i32
    return %c0_i32, %c0_i32_0 : i32, i32
  }
  func.func @transform_4(%arg0: i32) -> (i32, i32) {
    %c0_i32 = arith.constant 0 : i32
    %c0_i32_0 = arith.constant 0 : i32
    %c0_i32_1 = arith.constant 0 : i32
    return %c0_i32, %c0_i32_0 : i32, i32
  }
  func.func @transform_5(%arg0: i32) -> (i32, i32, i32) {
    %c0_i32 = arith.constant 0 : i32
    %c0_i32_0 = arith.constant 0 : i32
    %c0_i32_1 = arith.constant 0 : i32
    return %arg0, %c0_i32, %c0_i32_0 : i32, i32, i32
  }
}

</mosaic_0001>

<bundles_post_ra>
// kernel: tpu_custom_call.1
= control target key start
LH: loop header
LB: loop body
LE: loop exit
PB: predicated region body
PF: predicated region fallthrough
CT: control target
= control target key end

     0   :  { %s3270_s18 = smov 0   ;;  %s4520_s0 = inlined_call_operand.vmem [shape: f32[2,16,16,4], index: 0, kind: input, shape index: {}]   ;;  %s4521_s1 = inlined_call_operand.vmem [shape: bf16[36,8], index: 1, kind: input, shape index: {}]   ;;  %s4522_s2 = inlined_call_operand.vmem [shape: f32[1,8], index: 2, kind: input, shape index: {}]   ;;  %s4523_s3 = inlined_call_operand.vmem [shape: bf16[8,4], index: 3, kind: input, shape index: {}]   ;;  %s4524_s4 = inlined_call_operand.vmem [shape: f32[1,4], index: 4, kind: input, shape index: {}]   ;;  %s4525_s5 = inlined_call_operand.vmem [shape: f32[2,256,4], index: 5, kind: output, shape index: {}]  }
   0x1 LB: > { %s2345_s19 = sadd.s32 4294967295, %s3229_s18   ;;  %p2349_p0 = scmp.ge.s32.totalorder %s3229_s18, 1  ;;  %s3229_s18 = sphi %s3270_s18, %s15_s18  }
   0x2   : > { %p187_p1 = scmp.lt.s32.totalorder %s3229_s18, 3 }
   0x4   : > { %p188_p2 = pnand %p2349_p0, %p187_p1 }
   0x5   : > { %vm258_vm0 = vcmask (!%p188_p2), 31744   ;;  %vm261_vm1 = vcmask (!%p188_p2), 25600   ;;  %v3231_v0 = vmov (!%p188_p2), 0.0   ;;  %p215_p3 = scmp.lt.s32.totalorder (!%p188_p2), %s2345_s19, 1  ;;  %vm658_vm2 = vcmask (!%p188_p2), 1045504   ;;  %s3232_s24 = smov (!%p188_p2), 8  }
   0x6   : > { %191 = sbr.rel (%p188_p2) target bundleno = 855 (0x357), region = 40  ;;  %259 = vst.msk [vmem:[#allocation2] sm:$0xff] (!%p188_p2), %vm258_vm0, %v3231_v0  ;;  %260 = vst.msk [vmem:[#allocation2 + $0x8] sm:$0xff] (!%p188_p2), %vm258_vm0, %v3231_v0  ;;  %vm481_vm3 = vcmask (!%p188_p2), 1046528   ;;  %s3233_s25 = smov (!%p188_p2), 4   ;;  %vm1792_vm4 = vcmask (!%p188_p2), 1041408  }
   0x7   : > { %262 = vst.msk [vmem:[#allocation2 + $0x10] sm:$0x3] (!%p188_p2), %vm261_vm1, %v3231_v0  ;;  %265 = vst.msk [vmem:[#allocation2 + $0x28] sm:$0x3] (!%p188_p2), %vm261_vm1, %v3231_v0  ;;  %s3234_s26 = smov (!%p188_p2), 12   ;;  %s3235_s27 = smov (!%p188_p2), 24  }
   0x8   : > { %263 = vst.msk [vmem:[#allocation2 + $0x18] sm:$0xff] (!%p188_p2), %vm258_vm0, %v3231_v0  ;;  %264 = vst.msk [vmem:[#allocation2 + $0x20] sm:$0xff] (!%p188_p2), %vm258_vm0, %v3231_v0  ;;  %s3236_s30 = smov (!%p188_p2), 16   ;;  %s3237_s8 = smov (!%p188_p2), 20   ;;  %vm1469_vm5 = vcmask (!%p188_p2), 64512   ;;  %vm1502_vm6 = vcmask (!%p188_p2), 97280  }
   0x9   : > { %266 = vst.msk [vmem:[#allocation2 + $0x30] sm:$0xff] (!%p188_p2), %vm258_vm0, %v3231_v0  ;;  %267 = vst.msk [vmem:[#allocation2 + $0x38] sm:$0xff] (!%p188_p2), %vm258_vm0, %v3231_v0  ;;  %s3238_s9 = smov (!%p188_p2), 28   ;;  %s3239_s10 = smov (!%p188_p2), 32   ;;  %vm1535_vm7 = vcmask (!%p188_p2), 130048   ;;  %vm1568_vm8 = vcmask (!%p188_p2), 162816  }
   0xa   : > { %268 = vst.msk [vmem:[#allocation2 + $0x40] sm:$0x3] (!%p188_p2), %vm261_vm1, %v3231_v0  ;;  %271 = vst.msk [vmem:[#allocation2 + $0x58] sm:$0x3] (!%p188_p2), %vm261_vm1, %v3231_v0  ;;  %vm1601_vm9 = vcmask (!%p188_p2), 195584   ;;  %vm1634_vm10 = vcmask (!%p188_p2), 228352  }
   0xb   : > { %269 = vst.msk [vmem:[#allocation2 + $0x48] sm:$0xff] (!%p188_p2), %vm258_vm0, %v3231_v0  ;;  %270 = vst.msk [vmem:[#allocation2 + $0x50] sm:$0xff] (!%p188_p2), %vm258_vm0, %v3231_v0  ;;  %vm1667_vm11 = vcmask (!%p188_p2), 261120   ;;  %vm1743_vm12 = vcmask (!%p188_p2), 293888   ;;  %vm2061_vm13 = vcmask (!%p188_p2), 1043456  }
   0xc   : > { %272 = vst.msk [vmem:[#allocation2 + $0x60] sm:$0xff] (!%p188_p2), %vm258_vm0, %v3231_v0  ;;  %273 = vst.msk [vmem:[#allocation2 + $0x68] sm:$0xff] (!%p188_p2), %vm258_vm0, %v3231_v0 }
   0xd   : > { %274 = vst.msk [vmem:[#allocation2 + $0x70] sm:$0x3] %vm261_vm1, %v3231_v0  ;;  %277 = vst.msk [vmem:[#allocation2 + $0x88] sm:$0x3] %vm261_vm1, %v3231_v0  ;;  %s4527_s19 = smov (!%p215_p3, %s2345_s19), 1  ;;  %v3349_v4 = vld [vmem:[#allocation2] sm:$0xff] }
   0xe   : > { %275 = vst.msk [vmem:[#allocation2 + $0x78] sm:$0xff] %vm258_vm0, %v3231_v0  ;;  %276 = vst.msk [vmem:[#allocation2 + $0x80] sm:$0xff] %vm258_vm0, %v3231_v0  ;;  %s2393_s20 = sshll.u32 %s4527_s19, 8  ;;  %v3351_v5 = vld [vmem:[#allocation2 + $0x8] sm:$0xff]  ;;  %v381_v6 = vld [vmem:[#allocation2 + $0x10] sm:$0x3] }
   0xf   : > { %278 = vst.msk [vmem:[#allocation2 + $0x90] sm:$0xff] %vm258_vm0, %v3231_v0  ;;  %279 = vst.msk [vmem:[#allocation2 + $0x98] sm:$0xff] %vm258_vm0, %v3231_v0  ;;  %s3344_s23 = scalar_lea.vmem %s4520_s0, %s2393_s20  ;;  %v659_v9 = vrot.slane %v3349_v4, 2  ;;  %v660_v10 = vrot.slane %v3351_v5, 2  ;;  %v662_v11 = vrot.slane %v381_v6, 2  ;;  %v482_v12 = vrot.slane %v3349_v4, 1 }
  0x10   : > { %280 = vst.msk [vmem:[#allocation2 + $0xa0] sm:$0x3] %vm261_vm1, %v3231_v0  ;;  %283 = vst.msk [vmem:[#allocation2 + $0xb8] sm:$0x3] %vm261_vm1, %v3231_v0  ;;  %v228_v1 = vld [vmem:[%s3344_s23 + $0x10] sm:$0xff]  ;;  %v229_v2 = vld [vmem:[%s3344_s23 + $0x18] sm:$0xff] }
  0x11   : > { %281 = vst.msk [vmem:[#allocation2 + $0xa8] sm:$0xff] %vm258_vm0, %v3231_v0  ;;  %282 = vst.msk [vmem:[#allocation2 + $0xb0] sm:$0xff] %vm258_vm0, %v3231_v0  ;;  %v226_v3 = vld [vmem:[%s3344_s23] sm:$0xff]  ;;  %v316_v7 = vmax.f32 %v228_v1, 0.0  ;;  %v317_v8 = vmax.f32 %v229_v2, 0.0  ;;  %v227_v13 = vld [vmem:[%s3344_s23 + $0x8] sm:$0xff]  ;;  %v661_v21 = vsel %vm658_vm2, %v659_v9, %v660_v10  ;;  %v663_v22 = vsel %vm658_vm2, %v660_v10, %v662_v11 }
  0x12   : > { %284 = vst.msk [vmem:[#allocation2 + $0xc0] sm:$0xff] %vm258_vm0, %v3231_v0  ;;  %285 = vst.msk [vmem:[#allocation2 + $0xc8] sm:$0xff] %vm258_vm0, %v3231_v0  ;;  %v230_v14 = vld [vmem:[%s3344_s23 + $0x20] sm:$0xff]  ;;  %v483_v15 = vrot.slane %v3351_v5, 1  ;;  %v485_v16 = vrot.slane %v381_v6, 1  ;;  %v314_v17 = vmax.f32 %v226_v3, 0.0  ;;  %v2527_v28 = vpack.i.bf16 %v663_v22, %v661_v21 }
  0x13   : > { %286 = vst.msk [vmem:[#allocation2 + $0xd0] sm:$0x3] %vm261_vm1, %v3231_v0  ;;  %289 = vst.msk [vmem:[#allocation2 + $0xe8] sm:$0x3] %vm261_vm1, %v3231_v0  ;;  %v315_v18 = vmax.f32 %v227_v13, 0.0  ;;  %v231_v19 = vld [vmem:[%s3344_s23 + $0x28] sm:$0xff] }
  0x14   : > { %287 = vst.msk [vmem:[#allocation2 + $0xd8] sm:$0xff] %vm258_vm0, %v3231_v0  ;;  %288 = vst.msk [vmem:[#allocation2 + $0xe0] sm:$0xff] %vm258_vm0, %v3231_v0  ;;  %v232_v20 = vld [vmem:[%s3344_s23 + $0x30] sm:$0xff]  ;;  %v318_v23 = vmax.f32 %v230_v14, 0.0  ;;  %v319_v24 = vmax.f32 %v231_v19, 0.0  ;;  %v233_v25 = vld [vmem:[%s3344_s23 + $0x38] sm:$0xff]  ;;  %v484_v29 = vsel %vm481_vm3, %v482_v12, %v483_v15  ;;  %v486_v30 = vsel %vm481_vm3, %v483_v15, %v485_v16  ;;  %2528 = vrot.lane.b32.xlu1 %v2527_v28, %s3232_s24 }
  0x15   : > { %290 = vst.msk [vmem:[#allocation2 + $0xf0] sm:$0xff] %vm258_vm0, %v3231_v0  ;;  %291 = vst.msk [vmem:[#allocation2 + $0xf8] sm:$0xff] %vm258_vm0, %v3231_v0  ;;  %v234_v26 = vld [vmem:[%s3344_s23 + $0x40] sm:$0xff]  ;;  %v235_v27 = vld [vmem:[%s3344_s23 + $0x48] sm:$0xff]  ;;  %v320_v31 = vmax.f32 %v232_v20, 0.0  ;;  %v2522_v35 = vpack.i.bf16 %v486_v30, %v484_v29  ;;  %v321_v36 = vmax.f32 %v233_v25, 0.0 }
  0x16   : > { %292 = vst.msk [vmem:[#allocation2 + $0x100] sm:$0x3] %vm261_vm1, %v3231_v0  ;;  %295 = vst.msk [vmem:[#allocation2 + $0x118] sm:$0x3] %vm261_vm1, %v3231_v0  ;;  %v236_v32 = vld [vmem:[%s3344_s23 + $0x50] sm:$0xff]  ;;  %v237_v33 = vld [vmem:[%s3344_s23 + $0x58] sm:$0xff] }
  0x17   : > { %293 = vst.msk [vmem:[#allocation2 + $0x108] sm:$0xff] %vm258_vm0, %v3231_v0  ;;  %294 = vst.msk [vmem:[#allocation2 + $0x110] sm:$0xff] %vm258_vm0, %v3231_v0  ;;  %v238_v34 = vld [vmem:[%s3344_s23 + $0x60] sm:$0xff]  ;;  %v322_v37 = vmax.f32 %v234_v26, 0.0  ;;  %v323_v38 = vmax.f32 %v235_v27, 0.0  ;;  %v239_v39 = vld [vmem:[%s3344_s23 + $0x68] sm:$0xff]  ;;  %2523 = vrot.lane.b32.xlu0 %v2522_v35, %s3233_s25 }
  0x18   : > { %296 = vst.msk [vmem:[#allocation2 + $0x120] sm:$0xff] %vm258_vm0, %v3231_v0  ;;  %297 = vst.msk [vmem:[#allocation2 + $0x128] sm:$0xff] %vm258_vm0, %v3231_v0  ;;  %v240_v40 = vld [vmem:[%s3344_s23 + $0x70] sm:$0xff]  ;;  %v241_v41 = vld [vmem:[%s3344_s23 + $0x78] sm:$0xff]  ;;  %v324_v42 = vmax.f32 %v236_v32, 0.0  ;;  %v325_v43 = vmax.f32 %v237_v33, 0.0 }
  0x19   : > { %298 = vst.msk [vmem:[#allocation2 + $0x130] sm:$0x3] %vm261_vm1, %v3231_v0  ;;  %301 = vst.msk [vmem:[#allocation2 + $0x148] sm:$0x3] %vm261_vm1, %v3231_v0  ;;  %v326_v44 = vmax.f32 %v238_v34, 0.0  ;;  %v327_v45 = vmax.f32 %v239_v39, 0.0 }
  0x1a   : > { %299 = vst.msk [vmem:[#allocation2 + $0x138] sm:$0xff] %vm258_vm0, %v3231_v0  ;;  %300 = vst.msk [vmem:[#allocation2 + $0x140] sm:$0xff] %vm258_vm0, %v3231_v0  ;;  %v242_v46 = vld [vmem:[%s3344_s23 + $0x80] sm:$0xff]  ;;  %v243_v47 = vld [vmem:[%s3344_s23 + $0x88] sm:$0xff]  ;;  %v328_v48 = vmax.f32 %v240_v40, 0.0  ;;  %v329_v49 = vmax.f32 %v241_v41, 0.0 }
  0x1b   : > { %302 = vst.msk [vmem:[#allocation2 + $0x150] sm:$0xff] %vm258_vm0, %v3231_v0  ;;  %303 = vst.msk [vmem:[#allocation2 + $0x158] sm:$0xff] %vm258_vm0, %v3231_v0  ;;  %v330_v50 = vmax.f32 %v242_v46, 0.0  ;;  %v331_v51 = vmax.f32 %v243_v47, 0.0  ;;  %v244_v52 = vld [vmem:[%s3344_s23 + $0x90] sm:$0xff]  ;;  %v245_v53 = vld [vmem:[%s3344_s23 + $0x98] sm:$0xff] }
  0x1c   : > { %304 = vst.msk [vmem:[#allocation2 + $0x160] sm:$0x3] %vm261_vm1, %v3231_v0  ;;  %307 = vst.msk [vmem:[#allocation2 + $0x178] sm:$0x3] %vm261_vm1, %v3231_v0  ;;  %v332_v54 = vmax.f32 %v244_v52, 0.0  ;;  %v333_v55 = vmax.f32 %v245_v53, 0.0 }
  0x1d   : > { %305 = vst.msk [vmem:[#allocation2 + $0x168] sm:$0xff] %vm258_vm0, %v3231_v0  ;;  %306 = vst.msk [vmem:[#allocation2 + $0x170] sm:$0xff] %vm258_vm0, %v3231_v0  ;;  %v3162_v28 = vld [vmem:[%s4521_s1] sm:$0xff]   ;;  %v3163_v34 = vld [vmem:[%s4521_s1 + $0x8] sm:$0xff]  }
  0x1e   : > { %308 = vst.msk [vmem:[#allocation2 + $0x180] sm:$0xff] %vm258_vm0, %v3231_v0  ;;  %309 = vst.msk [vmem:[#allocation2 + $0x188] sm:$0xff] %vm258_vm0, %v3231_v0  ;;  %2431 = vmatprep.subr.bf16.mxu0 %v3162_v28 }
  0x1f   : > { %310 = vst.msk [vmem:[#allocation2 + $0x190] sm:$0x3] %vm261_vm1, %v3231_v0  ;;  %313 = vst.msk [vmem:[#allocation2 + $0x1a8] sm:$0x3] %vm261_vm1, %v3231_v0  ;;  %2432 = vmatpush3.bf16.msra.mxu0 %v3162_v28 }
  0x20   : > { %311 = vst.msk [vmem:[#allocation2 + $0x198] sm:$0xff] %vm258_vm0, %v3231_v0  ;;  %312 = vst.msk [vmem:[#allocation2 + $0x1a0] sm:$0xff] %vm258_vm0, %v3231_v0  ;;  %2433 = vmatprep.subr.bf16.mxu0 %v3163_v34 }
  0x21   : > { %349 = vst.msk [vmem:[#allocation2 + $0x31] sm:$0xff] %vm258_vm0, %v316_v7  ;;  %350 = vst.msk [vmem:[#allocation2 + $0x39] sm:$0xff] %vm258_vm0, %v317_v8 }
  0x22   : > { %347 = vst.msk [vmem:[#allocation2 + $0x19] sm:$0xff] %vm258_vm0, %v314_v17  ;;  %348 = vst.msk [vmem:[#allocation2 + $0x21] sm:$0xff] %vm258_vm0, %v315_v18 }
  0x23   : > { %351 = vst.msk [vmem:[#allocation2 + $0x49] sm:$0xff] %vm258_vm0, %v318_v23  ;;  %352 = vst.msk [vmem:[#allocation2 + $0x51] sm:$0xff] %vm258_vm0, %v319_v24  ;;  %2434 = vmatpush3.bf16.msra.mxu0 %v3163_v34 }
  0x24   : > { %353 = vst.msk [vmem:[#allocation2 + $0x61] sm:$0xff] %vm258_vm0, %v320_v31  ;;  %354 = vst.msk [vmem:[#allocation2 + $0x69] sm:$0xff] %vm258_vm0, %v321_v36 }
  0x25   : > { %355 = vst.msk [vmem:[#allocation2 + $0x79] sm:$0xff] %vm258_vm0, %v322_v37  ;;  %356 = vst.msk [vmem:[#allocation2 + $0x81] sm:$0xff] %vm258_vm0, %v323_v38 }
  0x26   : > { %357 = vst.msk [vmem:[#allocation2 + $0x91] sm:$0xff] %vm258_vm0, %v324_v42  ;;  %358 = vst.msk [vmem:[#allocation2 + $0x99] sm:$0xff] %vm258_vm0, %v325_v43 }
  0x27   : > { %359 = vst.msk [vmem:[#allocation2 + $0xa9] sm:$0xff] %vm258_vm0, %v326_v44  ;;  %360 = vst.msk [vmem:[#allocation2 + $0xb1] sm:$0xff] %vm258_vm0, %v327_v45 }
  0x28   : > { %v385_v56 = vld [vmem:[#allocation2 + $0x30] sm:$0xff]  ;;  %v386_v57 = vld [vmem:[#allocation2 + $0x38] sm:$0xff]  ;;  %v387_v58 = vld [vmem:[#allocation2 + $0x40] sm:$0x3]  ;;  %361 = vst.msk [vmem:[#allocation2 + $0xc1] sm:$0xff] %vm258_vm0, %v328_v48 }
  0x29   : > { %362 = vst.msk [vmem:[#allocation2 + $0xc9] sm:$0xff] %vm258_vm0, %v329_v49  ;;  %363 = vst.msk [vmem:[#allocation2 + $0xd9] sm:$0xff] %vm258_vm0, %v330_v50  ;;  %v2537_v59 = vpack.i.bf16 %v386_v57, %v385_v56  ;;  %v492_v60 = vrot.slane %v385_v56, 1  ;;  %v3400_v61 = vld [vmem:[#allocation2 + $0x18] sm:$0xff]  ;;  %v3402_v62 = vld [vmem:[#allocation2 + $0x20] sm:$0xff]  ;;  %v493_v0 = vrot.slane %v386_v57, 1 }
  0x2a   : > { %364 = vst.msk [vmem:[#allocation2 + $0xe1] sm:$0xff] %vm258_vm0, %v331_v51  ;;  %365 = vst.msk [vmem:[#allocation2 + $0xf1] sm:$0xff] %vm258_vm0, %v332_v54  ;;  %v384_v63 = vld [vmem:[#allocation2 + $0x28] sm:$0x3]  ;;  %v495_v1 = vrot.slane %v387_v58, 1  ;;  %v2532_v2 = vpack.i.bf16 %v3402_v62, %v3400_v61  ;;  %v3409_v6 = vld [vmem:[#allocation2 + $0x50] sm:$0xff] }
  0x2b   : > { %366 = vst.msk [vmem:[#allocation2 + $0xf9] sm:$0xff] %vm258_vm0, %v333_v55  ;;  %2538 = vrot.lane.b32.xlu1 %v2537_v59, %s3234_s26  ;;  %v3407_v3 = vld [vmem:[#allocation2 + $0x48] sm:$0xff]  ;;  %v664_v7 = vrot.slane %v3400_v61, 2  ;;  %v665_v8 = vrot.slane %v3402_v62, 2  ;;  %v667_v9 = vrot.slane %v384_v63, 2  ;;  %v487_v11 = vrot.slane %v3400_v61, 1 }
  0x2c   : > { %v3415_v10 = vpack.i.bf16 %v3409_v6, %v3407_v3  ;;  %v488_v12 = vrot.slane %v3402_v62, 1  ;;  %v490_v13 = vrot.slane %v384_v63, 1  ;;  %2533 = vrot.lane.b32.xlu0 %v2532_v2, %s3234_s26  ;;  %v669_v19 = vrot.slane %v385_v56, 2  ;;  %v390_v25 = vld [vmem:[#allocation2 + $0x58] sm:$0x3]  ;;  %v391_v44 = vld [vmem:[#allocation2 + $0x60] sm:$0xff] }
  0x2d   : > { %v666_v14 = vsel %vm658_vm2, %v664_v7, %v665_v8  ;;  %v668_v15 = vsel %vm658_vm2, %v665_v8, %v667_v9  ;;  %v494_v20 = vsel %vm481_vm3, %v492_v60, %v493_v0  ;;  %v496_v21 = vsel %vm481_vm3, %v493_v0, %v495_v1  ;;  %v392_v45 = vld [vmem:[#allocation2 + $0x68] sm:$0xff]  ;;  %v393_v46 = vld [vmem:[#allocation2 + $0x70] sm:$0x3]  ;;  %v395_v60 = vld [vmem:[#allocation2 + $0x80] sm:$0xff] }
  0x2e   : > { %v489_v16 = vsel %vm481_vm3, %v487_v11, %v488_v12  ;;  %v491_v17 = vsel %vm481_vm3, %v488_v12, %v490_v13  ;;  %v2557_v18 = vpack.i.bf16 %v668_v15, %v666_v14  ;;  %v670_v22 = vrot.slane %v386_v57, 2  ;;  %v396_v63 = vld [vmem:[#allocation2 + $0x88] sm:$0x3]  ;;  %v3164_v0 = vld [vmem:[%s4521_s1 + $0x10] ss:$0 sps:$4 sm:$0x33]  }
  0x2f   : > { %2548 = vrot.lane.b32.xlu1 %v3415_v10, %s3235_s27  ;;  %v672_v23 = vrot.slane %v387_v58, 2  ;;  %v2552_v24 = vpack.i.bf16 %v491_v17, %v489_v16  ;;  %v2567_v26 = vpack.i.bf16 %v496_v21, %v494_v20  ;;  %v497_v27 = vrot.slane %v3407_v3, 1  ;;  %v246_v1 = vld [vmem:[%s3344_s23 + $0xa0] sm:$0xff]  ;;  %v247_v9 = vld [vmem:[%s3344_s23 + $0xa8] sm:$0xff]  ;;  %2503 = vmatprep.subr.msk.bf16.mxu0 %vm1792_vm4, %v3164_v0  ;;  %v248_v12 = vld [vmem:[%s3344_s23 + $0xb0] sm:$0xff] }
  0x30   : > { %2543 = vrot.lane.b32.xlu0 %v2537_v59, %s3235_s27  ;;  %v671_v29 = vsel %vm658_vm2, %v669_v19, %v670_v22  ;;  %v498_v31 = vrot.slane %v3409_v6, 1  ;;  %v500_v32 = vrot.slane %v390_v25, 1  ;;  %v674_v38 = vrot.slane %v3407_v3, 2  ;;  %v394_v59 = vld [vmem:[#allocation2 + $0x78] sm:$0xff]  ;;  %v250_v14 = vld [vmem:[%s3344_s23 + $0xc0] sm:$0xff]  ;;  %v251_v16 = vld [vmem:[%s3344_s23 + $0xc8] sm:$0xff] }
  0x31   : > { %v673_v30 = vsel %vm658_vm2, %v670_v22, %v672_v23  ;;  %v675_v39 = vrot.slane %v3409_v6, 2  ;;  %v677_v40 = vrot.slane %v390_v25, 2  ;;  %v502_v47 = vrot.slane %v391_v44, 1  ;;  %v249_v13 = vld [vmem:[%s3344_s23 + $0xb8] sm:$0xff]  ;;  %v399_v34 = vld [vmem:[#allocation2 + $0xa0] sm:$0x3] }
  0x32   : > { %v2577_v33 = vpack.i.bf16 %v673_v30, %v671_v29  ;;  %v499_v35 = vsel %vm481_vm3, %v497_v27, %v498_v31  ;;  %v501_v36 = vsel %vm481_vm3, %v498_v31, %v500_v32  ;;  %v503_v48 = vrot.slane %v392_v45, 1  ;;  %v397_v31 = vld [vmem:[#allocation2 + $0x90] sm:$0xff]  ;;  %v398_v32 = vld [vmem:[#allocation2 + $0x98] sm:$0xff] }
  0x33   : > { %2558 = vrot.lane.b32.xlu1 %v2557_v18, %s3232_s24  ;;  %v2587_v37 = vpack.i.bf16 %v501_v36, %v499_v35  ;;  %v676_v41 = vsel %vm658_vm2, %v674_v38, %v675_v39  ;;  %v678_v42 = vsel %vm658_vm2, %v675_v39, %v677_v40  ;;  %v505_v49 = vrot.slane %v393_v46, 1  ;;  %v252_v38 = vld [vmem:[%s3344_s23 + $0xd0] sm:$0xff]  ;;  %v253_v39 = vld [vmem:[%s3344_s23 + $0xd8] sm:$0xff] }
  0x34   : > { %2553 = vrot.lane.b32.xlu0 %v2552_v24, %s3233_s25  ;;  %v2602_v43 = vpack.i.bf16 %v678_v42, %v676_v41  ;;  %v2627_v50 = vpack.i.bf16 %v392_v45, %v391_v44  ;;  %v679_v51 = vrot.slane %v391_v44, 2  ;;  %v504_v52 = vsel %vm481_vm3, %v502_v47, %v503_v48 }
  0x35   : > { %v506_v53 = vsel %vm481_vm3, %v503_v48, %v505_v49  ;;  %v680_v54 = vrot.slane %v392_v45, 2  ;;  %v682_v55 = vrot.slane %v393_v46, 2  ;;  %v507_v7 = vrot.slane %v394_v59, 1 }
  0x36   : > { %v2637_v56 = vpack.i.bf16 %v506_v53, %v504_v52  ;;  %v508_v8 = vrot.slane %v395_v60, 1  ;;  %v510_v11 = vrot.slane %v396_v63, 1  ;;  %v335_v15 = vmax.f32 %v247_v9, 0.0  ;;  %v255_v52 = vld [vmem:[%s3344_s23 + $0xe8] sm:$0xff] }
  0x37   : > { %2568 = vrot.lane.b32.xlu1 %v2567_v26, %s3236_s30  ;;  %v681_v57 = vsel %vm658_vm2, %v679_v51, %v680_v54  ;;  %v683_v58 = vsel %vm658_vm2, %v680_v54, %v682_v55  ;;  %v2657_v17 = vpack.i.bf16 %v395_v60, %v394_v59  ;;  %v1794_v19 = vsel %vm1792_vm4, %v3164_v0, 0  ;;  %v254_v51 = vld [vmem:[%s3344_s23 + $0xe0] sm:$0xff]  ;;  %v400_v53 = vld [vmem:[#allocation2 + $0xa8] sm:$0xff]  ;;  %v401_v54 = vld [vmem:[#allocation2 + $0xb0] sm:$0xff] }
  0x38   : > { %2563 = vrot.lane.b32.xlu0 %v2552_v24, %s3236_s30  ;;  %v2647_v2 = vpack.i.bf16 %v683_v58, %v681_v57  ;;  %v511_v20 = vsel %vm481_vm3, %v508_v8, %v510_v11  ;;  %368 = vst.msk [vmem:[#allocation2 + $0x111] sm:$0xff] %vm258_vm0, %v335_v15  ;;  %2436 = vmatpush3.bf16.msra.mxu0 %v1794_v19  ;;  %v336_v21 = vmax.f32 %v248_v12, 0.0  ;;  %v337_v22 = vmax.f32 %v249_v13, 0.0  ;;  %v402_v55 = vld [vmem:[#allocation2 + $0xb8] sm:$0x3]  ;;  %v403_v13 = vld [vmem:[#allocation2 + $0xc0] sm:$0xff] }
  0x39   : > { %v338_v23 = vmax.f32 %v250_v14, 0.0  ;;  %v339_v24 = vmax.f32 %v251_v16, 0.0  ;;  %v685_v27 = vrot.slane %v395_v60, 2  ;;  %v687_v28 = vrot.slane %v396_v63, 2  ;;  %v404_v14 = vld [vmem:[#allocation2 + $0xc8] sm:$0xff]  ;;  %v256_v15 = vld [vmem:[%s3344_s23 + $0xf0] sm:$0xff] }
  0x3a   : > { %369 = vst.msk [vmem:[#allocation2 + $0x121] sm:$0xff] %vm258_vm0, %v336_v21  ;;  %370 = vst.msk [vmem:[#allocation2 + $0x129] sm:$0xff] %vm258_vm0, %v337_v22  ;;  %v512_v35 = vrot.slane %v397_v31, 1  ;;  %v513_v36 = vrot.slane %v398_v32, 1  ;;  %v2707_v40 = vpack.i.bf16 %v398_v32, %v397_v31  ;;  %v689_v42 = vrot.slane %v397_v31, 2  ;;  %v257_v16 = vld [vmem:[%s3344_s23 + $0xf8] sm:$0xff] }
  0x3b   : > { %2578 = vrot.lane.b32.xlu1 %v2577_v33, %s3237_s8  ;;  %371 = vst.msk [vmem:[#allocation2 + $0x139] sm:$0xff] %vm258_vm0, %v338_v23  ;;  %372 = vst.msk [vmem:[#allocation2 + $0x141] sm:$0xff] %vm258_vm0, %v339_v24  ;;  %v688_v30 = vsel %vm658_vm2, %v685_v27, %v687_v28  ;;  %v690_v45 = vrot.slane %v398_v32, 2  ;;  %v692_v46 = vrot.slane %v399_v34, 2  ;;  %v341_v47 = vmax.f32 %v253_v39, 0.0 }
  0x3c   : > { %2573 = vrot.lane.b32.xlu0 %v2557_v18, %s3237_s8  ;;  %v509_v18 = vsel %vm481_vm3, %v507_v7, %v508_v8  ;;  %v514_v41 = vsel %vm481_vm3, %v512_v35, %v513_v36  ;;  %v343_v57 = vmax.f32 %v255_v52, 0.0  ;;  %v518_v60 = vrot.slane %v401_v54, 1  ;;  %v408_v35 = vld [vmem:[#allocation2 + $0xe8] sm:$0x3] }
  0x3d   : > { %v2667_v25 = vpack.i.bf16 %v511_v20, %v509_v18  ;;  %374 = vst.msk [vmem:[#allocation2 + $0x159] sm:$0xff] %vm258_vm0, %v341_v47  ;;  %v691_v49 = vsel %vm658_vm2, %v689_v42, %v690_v45  ;;  %v520_v63 = vrot.slane %v402_v55, 1  ;;  %v2737_v0 = vpack.i.bf16 %v401_v54, %v400_v53  ;;  %v405_v18 = vld [vmem:[#allocation2 + $0xd0] sm:$0x3] }
  0x3e   : > { %376 = vst.msk [vmem:[#allocation2 + $0x171] sm:$0xff] %vm258_vm0, %v343_v57  ;;  %v694_v8 = vrot.slane %v400_v53, 2  ;;  %v695_v9 = vrot.slane %v401_v54, 2  ;;  %v697_v11 = vrot.slane %v402_v55, 2  ;;  %v344_v19 = vmax.f32 %v256_v15, 0.0  ;;  %v409_v54 = vld [vmem:[#allocation2 + $0xf0] sm:$0xff] }
  0x3f   : > { %2588 = vrot.lane.b32.xlu1 %v2587_v37, %s3238_s9  ;;  %v345_v20 = vmax.f32 %v257_v16, 0.0  ;;  %v522_v21 = vrot.slane %v403_v13, 1  ;;  %v523_v22 = vrot.slane %v404_v14, 1  ;;  %v525_v23 = vrot.slane %v405_v18, 1  ;;  %v410_v55 = vld [vmem:[#allocation2 + $0xf8] sm:$0xff] }
  0x40   : > { %2583 = vrot.lane.b32.xlu0 %v2567_v26, %s3238_s9  ;;  %v698_v12 = vsel %vm658_vm2, %v695_v9, %v697_v11  ;;  %377 = vst.msk [vmem:[#allocation2 + $0x181] sm:$0xff] %vm258_vm0, %v344_v19  ;;  %v2787_v24 = vpack.i.bf16 %v404_v14, %v403_v13  ;;  %v700_v28 = vrot.slane %v404_v14, 2  ;;  %v530_v39 = vrot.slane %v408_v35, 1  ;;  %v411_v57 = vld [vmem:[#allocation2 + $0x100] sm:$0x3] }
  0x41   : > { %378 = vst.msk [vmem:[#allocation2 + $0x189] sm:$0xff] %vm258_vm0, %v345_v20  ;;  %v3583_v14 = vpack.i.bf16 %v410_v55, %v409_v54 }
  0x43   : > { %2598 = vrot.lane.b32.xlu1 %v2567_v26, %s3233_s25  ;;  %v684_v26 = vrot.slane %v394_v59, 2  ;;  %v517_v59 = vrot.slane %v400_v53, 1 }
  0x44   : > { %2593 = vrot.lane.b32.xlu0 %v2577_v33, %s3239_s10 }
  0x45   : > { %v686_v29 = vsel %vm658_vm2, %v684_v26, %v685_v27  ;;  %v526_v26 = vsel %vm481_vm3, %v523_v22, %v525_v23  ;;  %v699_v27 = vrot.slane %v403_v13, 2 }
  0x47   : > { %2608 = vrot.lane.b32.xlu1 %v2587_v37, %s3233_s25  ;;  %v701_v31 = vsel %vm658_vm2, %v699_v27, %v700_v28 }
  0x48   : > { %2603 = vrot.lane.b32.xlu0 %v2602_v43, %s3239_s10 }
  0x4b   : > { %2618 = vrot.lane.b32.xlu1 %v2602_v43, %s3232_s24 }
  0x4c   : > { %2613 = vrot.lane.b32.xlu0 %v2577_v33, %s3232_s24  ;;  %v2682_v33 = vpack.i.bf16 %v688_v30, %v686_v29  ;;  %v702_v29 = vrot.slane %v405_v18, 2 }
  0x4e   : > { %v703_v32 = vsel %vm658_vm2, %v700_v28, %v702_v29  ;;  %v3601_v28 = vld [vmem:[#allocation2 + $0x118] sm:$0x3] }
  0x4f   : > { %2628 = vrot.lane.b32.xlu1 %v2627_v50, %s3234_s26 }
  0x50   : > { %2623 = vrot.lane.b32.xlu0 %v3415_v10, %s3234_s26  ;;  %v334_v10 = vmax.f32 %v246_v1, 0.0  ;;  %v519_v1 = vsel %vm481_vm3, %v517_v59, %v518_v60 }
  0x52   : > { %367 = vst.msk [vmem:[#allocation2 + $0x109] sm:$0xff] %vm258_vm0, %v334_v10  ;;  %v696_v10 = vsel %vm658_vm2, %v694_v8, %v695_v9 }
  0x53   : > { %2638 = vrot.lane.b32.xlu1 %v2637_v56, %s3236_s30 }
  0x54   : > { %2633 = vrot.lane.b32.xlu0 %v2587_v37, %s3236_s30  ;;  %v515_v37 = vrot.slane %v399_v34, 1  ;;  %v407_v34 = vld [vmem:[#allocation2 + $0xe0] sm:$0xff] }
  0x56   : > { %v516_v44 = vsel %vm481_vm3, %v513_v36, %v515_v37  ;;  %v3542_v36 = vpack.i.bf16 %v703_v32, %v701_v31 }
  0x57   : > { %2648 = vrot.lane.b32.xlu1 %v2647_v2, %s3237_s8  ;;  %v2717_v48 = vpack.i.bf16 %v516_v44, %v514_v41 }
  0x58   : > { %2643 = vrot.lane.b32.xlu0 %v2602_v43, %s3237_s8  ;;  %v340_v43 = vmax.f32 %v252_v38, 0.0  ;;  %v528_v38 = vrot.slane %v407_v34, 1 }
  0x59   : > { %v3599_v27 = vld [vmem:[#allocation2 + $0x110] sm:$0xff] }
  0x5a   : > { %373 = vst.msk [vmem:[#allocation2 + $0x151] sm:$0xff] %vm258_vm0, %v340_v43  ;;  %v531_v43 = vsel %vm481_vm3, %v528_v38, %v530_v39 }
  0x5b   : > { %2658 = vrot.lane.b32.xlu1 %v2657_v17, %s3235_s27 }
  0x5c   : > { %2653 = vrot.lane.b32.xlu0 %v2627_v50, %s3235_s27  ;;  %v693_v50 = vsel %vm658_vm2, %v690_v45, %v692_v46 }
  0x5d   : > { %v2727_v58 = vpack.i.bf16 %v693_v50, %v691_v49  ;;  %v707_v49 = vrot.slane %v408_v35, 2 }
  0x5f   : > { %2668 = vrot.lane.b32.xlu1 %v2667_v25, %s3238_s9 }
  0x60   : > { %2663 = vrot.lane.b32.xlu0 %v2637_v56, %s3238_s9 }
  0x63   : > { %2678 = vrot.lane.b32.xlu1 %v2637_v56, %s3233_s25  ;;  %v342_v56 = vmax.f32 %v254_v51, 0.0 }
  0x64   : > { %2673 = vrot.lane.b32.xlu0 %v2647_v2, %s3239_s10 }
  0x65   : > { %375 = vst.msk [vmem:[#allocation2 + $0x169] sm:$0xff] %vm258_vm0, %v342_v56 }
  0x67   : > { %2688 = vrot.lane.b32.xlu1 %v2667_v25, %s3233_s25 }
  0x68   : > { %2683 = vrot.lane.b32.xlu0 %v2682_v33, %s3239_s10 }
  0x6b   : > { %2698 = vrot.lane.b32.xlu1 %v2682_v33, %s3232_s24 }
  0x6c   : > { %2693 = vrot.lane.b32.xlu0 %v2647_v2, %s3232_s24  ;;  %v521_v2 = vsel %vm481_vm3, %v518_v60, %v520_v63  ;;  %v532_v60 = vrot.slane %v409_v54, 1  ;;  %v533_v63 = vrot.slane %v410_v55, 1 }
  0x6d   : > { %v2747_v7 = vpack.i.bf16 %v521_v2, %v519_v1  ;;  %v709_v1 = vrot.slane %v409_v54, 2  ;;  %v710_v2 = vrot.slane %v410_v55, 2 }
  0x6e   : > { %v534_v15 = vsel %vm481_vm3, %v532_v60, %v533_v63 }
  0x6f   : > { %2708 = vrot.lane.b32.xlu1 %v2707_v40, %s3234_s26 }
  0x70   : > { %2703 = vrot.lane.b32.xlu0 %v2657_v17, %s3234_s26  ;;  %v2762_v17 = vpack.i.bf16 %v698_v12, %v696_v10 }
  0x73   : > { %2718 = vrot.lane.b32.xlu1 %v2717_v48, %s3236_s30 }
  0x74   : > { %2713 = vrot.lane.b32.xlu0 %v2667_v25, %s3236_s30  ;;  %v524_v25 = vsel %vm481_vm3, %v522_v21, %v523_v22  ;;  %v3593_v22 = vld [vmem:[#allocation2 + $0x108] sm:$0xff] }
  0x75   : > { %v2797_v30 = vpack.i.bf16 %v526_v26, %v524_v25 }
  0x77   : > { %2728 = vrot.lane.b32.xlu1 %v2727_v58, %s3237_s8 }
  0x78   : > { %2723 = vrot.lane.b32.xlu0 %v2682_v33, %s3237_s8  ;;  %v406_v33 = vld [vmem:[#allocation2 + $0xd8] sm:$0xff] }
  0x79   : > { %v527_v37 = vrot.slane %v406_v33, 1  ;;  %v3549_v41 = vpack.i.bf16 %v407_v34, %v406_v33  ;;  %v704_v47 = vrot.slane %v406_v33, 2 }
  0x7b   : > { %2738 = vrot.lane.b32.xlu1 %v2737_v0, %s3235_s27  ;;  %v529_v42 = vsel %vm481_vm3, %v527_v37, %v528_v38  ;;  %v540_v37 = vrot.slane %v3601_v28, 1 }
  0x7c   : > { %2733 = vrot.lane.b32.xlu0 %v2707_v40, %s3235_s27  ;;  %v3556_v45 = vpack.i.bf16 %v531_v43, %v529_v42 }
  0x7f   : > { %2748 = vrot.lane.b32.xlu1 %v2747_v7, %s3238_s9 }
  0x80   : > { %2743 = vrot.lane.b32.xlu0 %v2717_v48, %s3238_s9 }
  0x83   : > { %2758 = vrot.lane.b32.xlu1 %v2717_v48, %s3233_s25  ;;  %v705_v48 = vrot.slane %v407_v34, 2  ;;  %v537_v34 = vrot.slane %v3593_v22, 1 }
  0x84   : > { %2753 = vrot.lane.b32.xlu0 %v2727_v58, %s3239_s10 }
  0x85   : > { %v706_v52 = vsel %vm658_vm2, %v704_v47, %v705_v48  ;;  %v708_v53 = vsel %vm658_vm2, %v705_v48, %v707_v49 }
  0x86   : > { %v3547_v40 = vpop.permute.xlu1 %2528  ;;  %v3575_v59 = vpack.i.bf16 %v708_v53, %v706_v52 }
  0x87   : > { %2768 = vrot.lane.b32.xlu1 %v2747_v7, %s3233_s25  ;;  %v2531_v19 = vunpack.i.h.bf16 %v3547_v40  ;;  %v2530_v20 = vunpack.i.l.bf16 %v3547_v40 }
  0x88   : > { %2763 = vrot.lane.b32.xlu0 %v2762_v17, %s3239_s10 }
  0x89   : > { %v2524_v44 = vpop.permute.xlu0 %2523 }
  0x8a   : > { %v2526_v9 = vunpack.i.h.bf16 %v2524_v44  ;;  %v2525_v11 = vunpack.i.l.bf16 %v2524_v44 }
  0x8b   : > { %2778 = vrot.lane.b32.xlu1 %v2762_v17, %s3232_s24 }
  0x8c   : > { %2773 = vrot.lane.b32.xlu0 %v2727_v58, %s3232_s24  ;;  %v1438_v23 = vsel %vm258_vm0, %v3351_v5, %v2526_v9 }
  0x8f   : > { %2788 = vrot.lane.b32.xlu1 %v2787_v24, %s3234_s26 }
  0x90   : > { %2783 = vrot.lane.b32.xlu0 %v2737_v0, %s3234_s26  ;;  %v535_v0 = vrot.slane %v411_v57, 1 }
  0x92   : > { %v536_v16 = vsel %vm481_vm3, %v533_v63, %v535_v0  ;;  %v3640_v0 = vpack.i.bf16 %v3599_v27, %v3593_v22 }
  0x93   : > { %2798 = vrot.lane.b32.xlu1 %v2797_v30, %s3236_s30  ;;  %v3609_v5 = vpack.i.bf16 %v536_v16, %v534_v15 }
  0x94   : > { %2793 = vrot.lane.b32.xlu0 %v2747_v7, %s3236_s30  ;;  %v712_v7 = vrot.slane %v411_v57, 2 }
  0x96   : > { %v713_v18 = vsel %vm658_vm2, %v710_v2, %v712_v7 }
  0x97   : > { %2808 = vrot.lane.b32.xlu1 %v3542_v36, %s3237_s8 }
  0x98   : > { %2803 = vrot.lane.b32.xlu0 %v2762_v17, %s3237_s8  ;;  %v711_v17 = vsel %vm658_vm2, %v709_v1, %v710_v2 }
  0x9b   : > { %2818 = vrot.lane.b32.xlu1 %v3549_v41, %s3235_s27 }
  0x9c   : > { %2813 = vrot.lane.b32.xlu0 %v2787_v24, %s3235_s27  ;;  %v1437_v24 = vsel %vm258_vm0, %v3349_v4, %v2525_v11  ;;  %v3611_v4 = vpack.i.bf16 %v713_v18, %v711_v17 }
  0x9d   : > { %v3559_v46 = vpop.permute.xlu1 %2538 }
  0x9e   : > { %v3561_v50 = vpop.permute.xlu0 %2533  ;;  %v2541_v43 = vunpack.i.h.bf16 %v3559_v46  ;;  %v2540_v44 = vunpack.i.l.bf16 %v3559_v46 }
  0x9f   : > { %2828 = vrot.lane.b32.xlu1 %v3556_v45, %s3238_s9  ;;  %v2536_v32 = vunpack.i.h.bf16 %v3561_v50  ;;  %v2535_v33 = vunpack.i.l.bf16 %v3561_v50 }
  0xa0   : > { %2823 = vrot.lane.b32.xlu0 %v2797_v30, %s3238_s9 }
  0xa1   : > { %v3566_v51 = vpop.permute.xlu1 %2548 }
  0xa2   : > { %v3570_v56 = vpop.permute.xlu0 %2543 }
  0xa3   : > { %2838 = vrot.lane.b32.xlu1 %v2797_v30, %s3233_s25  ;;  %v2546_v11 = vunpack.i.h.bf16 %v3570_v56 }
  0xa4   : > { %2833 = vrot.lane.b32.xlu0 %v3542_v36, %s3239_s10 }
  0xa5   : > { %v2559_v58 = vpop.permute.xlu1 %2558 }
  0xa6   : > { %v2554_v8 = vpop.permute.xlu0 %2553  ;;  %v2561_v25 = vunpack.i.h.bf16 %v2559_v58  ;;  %v2560_v26 = vunpack.i.l.bf16 %v2559_v58 }
  0xa7   : > { %2848 = vrot.lane.b32.xlu1 %v3556_v45, %s3233_s25  ;;  %v2556_v10 = vunpack.i.h.bf16 %v2554_v8  ;;  %v2555_v12 = vunpack.i.l.bf16 %v2554_v8 }
  0xa8   : > { %2843 = vrot.lane.b32.xlu0 %v3575_v59, %s3239_s10 }
  0xa9   : > { %v3581_v13 = vpop.permute.xlu1 %2568  ;;  %v1440_v29 = vsel %vm258_vm0, %v3402_v62, %v2556_v10  ;;  %v1439_v30 = vsel %vm258_vm0, %v3400_v61, %v2555_v12  ;;  %v1470_v62 = vsel %vm1469_vm5, %v1437_v24, %v2530_v20  ;;  %v1471_v61 = vsel %vm1469_vm5, %v1438_v23, %v2531_v19 }
  0xaa   : > { %v2564_v21 = vpop.permute.xlu0 %2563  ;;  %v1473_v38 = vsel %vm1469_vm5, %v1440_v29, %v2561_v25  ;;  %v1472_v39 = vsel %vm1469_vm5, %v1439_v30, %v2560_v26  ;;  %v1504_v50 = vsel %vm1502_vm6, %v1471_v61, %v2536_v32  ;;  %v1503_v52 = vsel %vm1502_vm6, %v1470_v62, %v2535_v33 }
  0xab   : > { %2858 = vrot.lane.b32.xlu1 %v3575_v59, %s3232_s24  ;;  %v2566_v40 = vunpack.i.h.bf16 %v2564_v21  ;;  %v2565_v42 = vunpack.i.l.bf16 %v2564_v21  ;;  %v2571_v53 = vunpack.i.h.bf16 %v3581_v13  ;;  %v2570_v54 = vunpack.i.l.bf16 %v3581_v13 }
  0xac   : > { %2853 = vrot.lane.b32.xlu0 %v3542_v36, %s3232_s24  ;;  %v538_v36 = vrot.slane %v3599_v27, 1  ;;  %v1505_v55 = vsel %vm1502_vm6, %v1472_v39, %v2540_v44  ;;  %v1506_v57 = vsel %vm1502_vm6, %v1473_v38, %v2541_v43  ;;  %v2545_v10 = vunpack.i.l.bf16 %v3570_v56 }
  0xad   : > { %v2579_v31 = vpop.permute.xlu1 %2578  ;;  %v1536_v63 = vsel %vm1535_vm7, %v1503_v52, %v2565_v42  ;;  %v1538_v12 = vsel %vm1535_vm7, %v1505_v55, %v2570_v54  ;;  %v1539_v13 = vsel %vm1535_vm7, %v1506_v57, %v2571_v53  ;;  %v2551_v30 = vunpack.i.h.bf16 %v3566_v51  ;;  %v416_v52 = vld [vmem:[#allocation2 + $0x128] sm:$0xff] }
  0xae   : > { %v2574_v35 = vpop.permute.xlu0 %2573  ;;  %v2581_v58 = vunpack.i.h.bf16 %v2579_v31  ;;  %v2580_v46 = vunpack.i.l.bf16 %v2579_v31  ;;  %v541_v18 = vsel %vm481_vm3, %v538_v36, %v540_v37  ;;  %v2550_v31 = vunpack.i.l.bf16 %v3566_v51 }
  0xaf   : > { %2868 = vrot.lane.b32.xlu1 %v3583_v14, %s3234_s26  ;;  %v2576_v47 = vunpack.i.h.bf16 %v2574_v35  ;;  %v2575_v48 = vunpack.i.l.bf16 %v2574_v35  ;;  %v715_v44 = vrot.slane %v3599_v27, 2  ;;  %v415_v27 = vld [vmem:[#allocation2 + $0x120] sm:$0xff] }
  0xb0   : > { %2863 = vrot.lane.b32.xlu0 %v3549_v41, %s3234_s26  ;;  %v1537_v41 = vsel %vm1535_vm7, %v1504_v50, %v2566_v40  ;;  %v1571_v15 = vsel %vm1568_vm8, %v1538_v12, %v2580_v46  ;;  %v1572_v16 = vsel %vm1568_vm8, %v1539_v13, %v2581_v58  ;;  %v714_v40 = vrot.slane %v3593_v22, 2 }
  0xb1   : > { %v2589_v49 = vpop.permute.xlu1 %2588  ;;  %v1569_v1 = vsel %vm1568_vm8, %v1536_v63, %v2575_v48  ;;  %v1570_v2 = vsel %vm1568_vm8, %v1537_v41, %v2576_v47  ;;  %v1604_v61 = vsel %vm1601_vm9, %v1571_v15, %v2550_v31  ;;  %v1605_v35 = vsel %vm1601_vm9, %v1572_v16, %v2551_v30 }
  0xb2   : > { %v2584_v60 = vpop.permute.xlu0 %2583  ;;  %v1602_v56 = vsel %vm1601_vm9, %v1569_v1, %v2545_v10  ;;  %v1603_v21 = vsel %vm1601_vm9, %v1570_v2, %v2546_v11  ;;  %v2591_v23 = vunpack.i.h.bf16 %v2589_v49  ;;  %v2590_v24 = vunpack.i.l.bf16 %v2589_v49  ;;  %v3713_v2 = vld [vmem:[#allocation2 + $0x138] sm:$0xff] }
  0xb3   : > { %2878 = vrot.lane.b32.xlu1 %v3609_v5, %s3236_s30  ;;  %v2586_v7 = vunpack.i.h.bf16 %v2584_v60  ;;  %v2585_v8 = vunpack.i.l.bf16 %v2584_v60  ;;  %v717_v47 = vrot.slane %v3601_v28, 2  ;;  %v716_v49 = vsel %vm658_vm2, %v714_v40, %v715_v44  ;;  %v417_v28 = vld [vmem:[#allocation2 + $0x130] sm:$0x3] }
  0xb4   : > { %2873 = vrot.lane.b32.xlu0 %v3556_v45, %s3236_s30  ;;  %v539_v45 = vsel %vm481_vm3, %v537_v34, %v538_v36  ;;  %v1637_v38 = vsel %vm1634_vm10, %v1604_v61, %v2590_v24  ;;  %v1638_v51 = vsel %vm1634_vm10, %v1605_v35, %v2591_v23  ;;  %v542_v57 = vrot.slane %v415_v27, 1 }
  0xb5   : > { %v3646_v9 = vpop.permute.xlu1 %2598  ;;  %v1635_v26 = vsel %vm1634_vm10, %v1602_v56, %v2585_v8  ;;  %v1636_v29 = vsel %vm1634_vm10, %v1603_v21, %v2586_v7  ;;  %v718_v50 = vsel %vm658_vm2, %v715_v44, %v717_v47  ;;  %v543_v58 = vrot.slane %v416_v52, 1  ;;  %v3717_v7 = vld [vmem:[#allocation2 + $0x148] sm:$0x3] }
  0xb6   : > { %v2594_v17 = vpop.permute.xlu0 %2593  ;;  %v3707_v55 = vpack.i.bf16 %v718_v50, %v716_v49  ;;  %v545_v46 = vrot.slane %v417_v28, 1  ;;  %v719_v60 = vrot.slane %v415_v27, 2  ;;  %v720_v41 = vrot.slane %v416_v52, 2 }
  0xb7   : > { %2888 = vrot.lane.b32.xlu1 %v3611_v4, %s3237_s8  ;;  %v2596_v19 = vunpack.i.h.bf16 %v2594_v17  ;;  %v2595_v20 = vunpack.i.l.bf16 %v2594_v17  ;;  %v722_v1 = vrot.slane %v417_v28, 2  ;;  %v544_v11 = vsel %vm481_vm3, %v542_v57, %v543_v58 }
  0xb8   : > { %2883 = vrot.lane.b32.xlu0 %v3575_v59, %s3237_s8  ;;  %v3672_v59 = vpack.i.bf16 %v541_v18, %v539_v45  ;;  %v546_v10 = vsel %vm481_vm3, %v543_v58, %v545_v46  ;;  %v3725_v12 = vpack.i.bf16 %v416_v52, %v415_v27  ;;  %v721_v13 = vsel %vm658_vm2, %v719_v60, %v720_v41 }
  0xb9   : > { %v3662_v25 = vpop.permute.xlu1 %2608  ;;  %v1668_v32 = vsel %vm1667_vm11, %v1635_v26, %v2595_v20  ;;  %v1669_v33 = vsel %vm1667_vm11, %v1636_v29, %v2596_v19  ;;  %v723_v16 = vsel %vm658_vm2, %v720_v41, %v722_v1  ;;  %v547_v17 = vrot.slane %v3713_v2, 1 }
  0xba   : > { %v2604_v34 = vpop.permute.xlu0 %2603  ;;  %v1700_v62 = vpack.c.bf16 %v1669_v33, %v1668_v32  ;;  %v550_v18 = vrot.slane %v3717_v7, 1  ;;  %v2611_v19 = vunpack.i.h.bf16 %v3662_v25  ;;  %v2610_v20 = vunpack.i.l.bf16 %v3662_v25 }
  0xbb   : > { %2898 = vrot.lane.b32.xlu1 %v3640_v0, %s3235_s27  ;;  %v2606_v36 = vunpack.i.h.bf16 %v2604_v34  ;;  %v2605_v37 = vunpack.i.l.bf16 %v2604_v34  ;;  %v3738_v56 = vpack.i.bf16 %v546_v10, %v544_v11  ;;  %v2601_v23 = vunpack.i.h.bf16 %v3646_v9 }
  0xbc   : > { %2893 = vrot.lane.b32.xlu0 %v3583_v14, %s3235_s27  ;;  %2437 = vmatprep.mubr.msk.bf16.mxu0 %vm1743_vm12, %v1700_v62  ;;  %v2600_v24 = vunpack.i.l.bf16 %v3646_v9  ;;  %v3754_v32 = vpack.i.bf16 %v723_v16, %v721_v13  ;;  %v1444_v61 = vsel %vm258_vm0, %v3409_v6, %v2611_v19  ;;  %v1443_v35 = vsel %vm258_vm0, %v3407_v3, %v2610_v20 }
  0xbd   : > { %v3681_v39 = vpop.permute.xlu1 %2618  ;;  %v1670_v42 = vsel %vm1667_vm11, %v1637_v38, %v2605_v37  ;;  %v1671_v43 = vsel %vm1667_vm11, %v1638_v51, %v2606_v36  ;;  %v3165_v38 = vld [vmem:[#allocation2 + $0x38] sm:$0xff] }
  0xbe   : > { %v3688_v48 = vpop.permute.xlu0 %2613  ;;  %v1701_v14 = vpack.c.bf16 %v1671_v43, %v1670_v42  ;;  %v2621_v26 = vunpack.i.h.bf16 %v3681_v39  ;;  %v2620_v29 = vunpack.i.l.bf16 %v3681_v39  ;;  %v1442_v51 = vsel %vm258_vm0, %v3165_v38, %v2601_v23  ;;  %v3166_v39 = vld [vmem:[#allocation2 + $0x30] sm:$0xff] }
  0xbf   : > { %2908 = vrot.lane.b32.xlu1 %v3672_v59, %s3238_s9  ;;  %v2616_v25 = vunpack.i.h.bf16 %v3688_v48  ;;  %v2615_v31 = vunpack.i.l.bf16 %v3688_v48  ;;  %v1441_v40 = vsel %vm258_vm0, %v3166_v39, %v2600_v24 }
  0xc0   : > { %2903 = vrot.lane.b32.xlu0 %v3609_v5, %s3238_s9  ;;  %2438 = vmatmul.mubr.msk.bf16.vlgmr.msra.gmra.mrb[0].mxu0 %vm1743_vm12, %v1701_v14  ;;  %v1476_v42 = vsel %vm1469_vm5, %v1443_v35, %v2620_v29  ;;  %v1477_v43 = vsel %vm1469_vm5, %v1444_v61, %v2621_v26 }
  0xc1   : > { %v3695_v22 = vpop.permute.xlu1 %2628  ;;  %v1475_v3 = vsel %vm1469_vm5, %v1442_v51, %v2616_v25  ;;  %v1474_v44 = vsel %vm1469_vm5, %v1441_v40, %v2615_v31 }
  0xc2   : > { %v3699_v53 = vpop.permute.xlu0 %2623  ;;  %v2631_v33 = vunpack.i.h.bf16 %v3695_v22  ;;  %v2630_v34 = vunpack.i.l.bf16 %v3695_v22 }
  0xc3   : > { %2918 = vrot.lane.b32.xlu1 %v3609_v5, %s3233_s25  ;;  %v3715_v5 = vld [vmem:[#allocation2 + $0x140] sm:$0xff]  ;;  %v2626_v36 = vunpack.i.h.bf16 %v3699_v53  ;;  %v2625_v37 = vunpack.i.l.bf16 %v3699_v53 }
  0xc4   : > { %2913 = vrot.lane.b32.xlu0 %v3611_v4, %s3239_s10  ;;  %v548_v45 = vrot.slane %v3715_v5, 1  ;;  %v3742_v21 = vpack.i.bf16 %v3715_v5, %v3713_v2  ;;  %v1509_v14 = vsel %vm1502_vm6, %v1476_v42, %v2630_v34  ;;  %v1510_v22 = vsel %vm1502_vm6, %v1477_v43, %v2631_v33 }
  0xc5   : > { %v3705_v54 = vpop.permute.xlu1 %2638  ;;  %v1508_v52 = vsel %vm1502_vm6, %v1475_v3, %v2626_v36  ;;  %v725_v43 = vrot.slane %v3715_v5, 2 }
  0xc6   : > { %v3709_v63 = vpop.permute.xlu0 %2633  ;;  %v3761_v62 = vsel %vm481_vm3, %v547_v17, %v548_v45  ;;  %v2641_v57 = vunpack.i.h.bf16 %v3705_v54  ;;  %v2640_v58 = vunpack.i.l.bf16 %v3705_v54 }
  0xc7   : > { %2928 = vrot.lane.b32.xlu1 %v3672_v59, %s3233_s25  ;;  %v2636_v47 = vunpack.i.h.bf16 %v3709_v63  ;;  %v2635_v48 = vunpack.i.l.bf16 %v3709_v63 }
  0xc8   : > { %2923 = vrot.lane.b32.xlu0 %v3707_v55, %s3239_s10  ;;  %v1542_v29 = vsel %vm1535_vm7, %v1509_v14, %v2640_v58 }
  0xc9   : > { %v3721_v8 = vpop.permute.xlu1 %2648  ;;  %v1541_v1 = vsel %vm1535_vm7, %v1508_v52, %v2636_v47  ;;  %v422_v47 = vld [vmem:[#allocation2 + $0x158] sm:$0xff]  ;;  %v3858_v52 = vld [vmem:[#allocation2 + $0x168] sm:$0xff] }
  0xca   : > { %v3728_v15 = vpop.permute.xlu0 %2643  ;;  %v2651_v11 = vunpack.i.h.bf16 %v3721_v8  ;;  %v2650_v10 = vunpack.i.l.bf16 %v3721_v8 }
  0xcb   : > { %2938 = vrot.lane.b32.xlu1 %v3707_v55, %s3232_s24  ;;  %v2646_v49 = vunpack.i.h.bf16 %v3728_v15  ;;  %v2645_v50 = vunpack.i.l.bf16 %v3728_v15 }
  0xcc   : > { %2933 = vrot.lane.b32.xlu0 %v3611_v4, %s3232_s24  ;;  %v551_v4 = vsel %vm481_vm3, %v548_v45, %v550_v18  ;;  %v1575_v33 = vsel %vm1568_vm8, %v1542_v29, %v2650_v10 }
  0xcd   : > { %v3750_v30 = vpop.permute.xlu1 %2658  ;;  %v1574_v15 = vsel %vm1568_vm8, %v1541_v1, %v2646_v49  ;;  %v553_v49 = vrot.slane %v422_v47, 1  ;;  %v557_v1 = vrot.slane %v3858_v52, 1 }
  0xce   : > { %v2654_v9 = vpop.permute.xlu0 %2653  ;;  %v2661_v54 = vunpack.i.h.bf16 %v3750_v30  ;;  %v2660_v16 = vunpack.i.l.bf16 %v3750_v30  ;;  %v1543_v30 = vsel %vm1535_vm7, %v1510_v22, %v2641_v57 }
  0xcf   : > { %2948 = vrot.lane.b32.xlu1 %v3725_v12, %s3234_s26  ;;  %v2656_v28 = vunpack.i.h.bf16 %v2654_v9  ;;  %v2655_v53 = vunpack.i.l.bf16 %v2654_v9  ;;  %v1576_v34 = vsel %vm1568_vm8, %v1543_v30, %v2651_v11 }
  0xd0   : > { %2943 = vrot.lane.b32.xlu0 %v3640_v0, %s3234_s26  ;;  %v1507_v0 = vsel %vm1502_vm6, %v1474_v44, %v2625_v37  ;;  %v1608_v35 = vsel %vm1601_vm9, %v1575_v33, %v2660_v16  ;;  %v1609_v36 = vsel %vm1601_vm9, %v1576_v34, %v2661_v54 }
  0xd1   : > { %v2669_v6 = vpop.permute.xlu1 %2668  ;;  %v1540_v63 = vsel %vm1535_vm7, %v1507_v0, %v2635_v48  ;;  %v1607_v45 = vsel %vm1601_vm9, %v1574_v15, %v2656_v28  ;;  %v423_v48 = vld [vmem:[#allocation2 + $0x160] sm:$0x3]  ;;  %v3860_v28 = vld [vmem:[#allocation2 + $0x170] sm:$0xff] }
  0xd2   : > { %v2664_v27 = vpop.permute.xlu0 %2663  ;;  %v1573_v13 = vsel %vm1568_vm8, %v1540_v63, %v2645_v50  ;;  %v2671_v20 = vunpack.i.h.bf16 %v2669_v6  ;;  %v2670_v8 = vunpack.i.l.bf16 %v2669_v6  ;;  %v727_v6 = vrot.slane %v3717_v7, 2 }
  0xd3   : > { %2958 = vrot.lane.b32.xlu1 %v3738_v56, %s3236_s30  ;;  %v2666_v46 = vunpack.i.h.bf16 %v2664_v27  ;;  %v2665_v60 = vunpack.i.l.bf16 %v2664_v27  ;;  %v555_v50 = vrot.slane %v423_v48, 1  ;;  %v558_v11 = vrot.slane %v3860_v28, 1 }
  0xd4   : > { %2953 = vrot.lane.b32.xlu0 %v3672_v59, %s3236_s30  ;;  %v1606_v59 = vsel %vm1601_vm9, %v1573_v13, %v2655_v53  ;;  %v1641_v51 = vsel %vm1634_vm10, %v1608_v35, %v2670_v8  ;;  %v1642_v39 = vsel %vm1634_vm10, %v1609_v36, %v2671_v20  ;;  %v728_v7 = vsel %vm658_vm2, %v725_v43, %v727_v6  ;;  %v3862_v53 = vld [vmem:[#allocation2 + $0x178] sm:$0x3] }
  0xd5   : > { %v3792_v41 = vpop.permute.xlu1 %2678  ;;  %v1639_v23 = vsel %vm1634_vm10, %v1606_v59, %v2665_v60  ;;  %v1640_v24 = vsel %vm1634_vm10, %v1607_v45, %v2666_v46  ;;  %v730_v46 = vrot.slane %v422_v47, 2  ;;  %v732_v60 = vrot.slane %v423_v48, 2  ;;  %v3168_v36 = vld [vmem:[#allocation2 + $0x78] sm:$0xff] }
  0xd6   : > { %v2674_v17 = vpop.permute.xlu0 %2673  ;;  %v556_v63 = vsel %vm481_vm3, %v553_v49, %v555_v50  ;;  %v560_v10 = vrot.slane %v3862_v53, 1  ;;  %v2681_v8 = vunpack.i.h.bf16 %v3792_v41  ;;  %v3905_v33 = vpack.i.bf16 %v3860_v28, %v3858_v52 }
  0xd7   : > { %2968 = vrot.lane.b32.xlu1 %v3754_v32, %s3237_s8  ;;  %v2676_v18 = vunpack.i.h.bf16 %v2674_v17  ;;  %v2675_v19 = vunpack.i.l.bf16 %v2674_v17  ;;  %v733_v59 = vsel %vm658_vm2, %v730_v46, %v732_v60 }
  0xd8   : > { %2963 = vrot.lane.b32.xlu0 %v3707_v55, %s3237_s8  ;;  %v3821_v55 = vpack.i.bf16 %v551_v4, %v3761_v62  ;;  %v724_v62 = vrot.slane %v3713_v2, 2  ;;  %v561_v20 = vsel %vm481_vm3, %v558_v11, %v560_v10 }
  0xd9   : > { %v3810_v26 = vpop.permute.xlu1 %2688  ;;  %v1672_v25 = vsel %vm1667_vm11, %v1639_v23, %v2675_v19  ;;  %v1673_v31 = vsel %vm1667_vm11, %v1640_v24, %v2676_v18  ;;  %v559_v19 = vsel %vm481_vm3, %v557_v1, %v558_v11  ;;  %v2680_v23 = vunpack.i.l.bf16 %v3792_v41 }
  0xda   : > { %v1702_v9 = vpack.c.bf16 %v1673_v31, %v1672_v25  ;;  %v2684_v61 = vpop.permute.xlu0 %2683  ;;  %v726_v5 = vsel %vm658_vm2, %v724_v62, %v725_v43  ;;  %v2691_v45 = vunpack.i.h.bf16 %v3810_v26  ;;  %v2690_v18 = vunpack.i.l.bf16 %v3810_v26  ;;  %v3170_v62 = vld [vmem:[#allocation2 + $0x60] sm:$0xff] }
  0xdb   : > { %2978 = vrot.lane.b32.xlu1 %v3742_v21, %s3235_s27  ;;  %v2686_v37 = vunpack.i.h.bf16 %v2684_v61  ;;  %v2685_v38 = vunpack.i.l.bf16 %v2684_v61  ;;  %v3856_v0 = vpack.i.bf16 %v728_v7, %v726_v5  ;;  %v3167_v61 = vld [vmem:[#allocation2 + $0x80] sm:$0xff] }
  0xdc   : > { %2973 = vrot.lane.b32.xlu0 %v3725_v12, %s3235_s27  ;;  %2441 = vmatprep.mubr.msk.bf16.mxu0 %vm1743_vm12, %v1702_v9  ;;  %v421_v12 = vld [vmem:[#allocation2 + $0x150] sm:$0xff]  ;;  %v1448_v35 = vsel %vm258_vm0, %v3167_v61, %v2691_v45 }
  0xdd   : > { %v3830_v40 = vpop.permute.xlu1 %2698  ;;  %v1675_v4 = vsel %vm1667_vm11, %v1642_v39, %v2686_v37  ;;  %v1674_v42 = vsel %vm1667_vm11, %v1641_v51, %v2685_v38  ;;  %v552_v22 = vrot.slane %v421_v12, 1  ;;  %v729_v58 = vrot.slane %v421_v12, 2  ;;  %v3169_v39 = vld [vmem:[#allocation2 + $0x68] sm:$0xff] }
  0xde   : > { %v1703_v3 = vpack.c.bf16 %v1675_v4, %v1674_v42  ;;  %v3837_v44 = vpop.permute.xlu0 %2693  ;;  %v3877_v15 = vpack.i.bf16 %v422_v47, %v421_v12  ;;  %v2701_v24 = vunpack.i.h.bf16 %v3830_v40  ;;  %v2700_v29 = vunpack.i.l.bf16 %v3830_v40 }
  0xdf   : > { %2988 = vrot.lane.b32.xlu1 %v3821_v55, %s3238_s9  ;;  %v731_v17 = vsel %vm658_vm2, %v729_v58, %v730_v46  ;;  %v2696_v25 = vunpack.i.h.bf16 %v3837_v44  ;;  %v2695_v26 = vunpack.i.l.bf16 %v3837_v44  ;;  %v1447_v37 = vsel %vm258_vm0, %v3168_v36, %v2690_v18 }
  0xe0   : > { %2983 = vrot.lane.b32.xlu0 %v3738_v56, %s3238_s9  ;;  %2442 = vmatmul.mubr.msk.bf16.gmra.mrb[4].mxu0 %vm1743_vm12, %v1703_v3  ;;  %v3901_v31 = vpack.i.bf16 %v733_v59, %v731_v17  ;;  %v1446_v40 = vsel %vm258_vm0, %v3169_v39, %v2681_v8  ;;  %v1445_v4 = vsel %vm258_vm0, %v3170_v62, %v2680_v23  ;;  %v734_v62 = vrot.slane %v3858_v52, 2 }
  0xe1   : > { %v3844_v2 = vpop.permute.xlu1 %2708  ;;  %v1480_v42 = vsel %vm1469_vm5, %v1447_v37, %v2700_v29  ;;  %v1481_v43 = vsel %vm1469_vm5, %v1448_v35, %v2701_v24  ;;  %v1479_v3 = vsel %vm1469_vm5, %v1446_v40, %v2696_v25  ;;  %v1478_v44 = vsel %vm1469_vm5, %v1445_v4, %v2695_v26 }
  0xe2   : > { %v3848_v14 = vpop.permute.xlu0 %2703  ;;  %v2711_v41 = vunpack.i.h.bf16 %v3844_v2  ;;  %v2710_v34 = vunpack.i.l.bf16 %v3844_v2  ;;  %v735_v4 = vrot.slane %v3860_v28, 2 }
  0xe3   : > { %2998 = vrot.lane.b32.xlu1 %v3738_v56, %s3233_s25  ;;  %v554_v56 = vsel %vm481_vm3, %v552_v22, %v553_v49  ;;  %v2706_v38 = vunpack.i.h.bf16 %v3848_v14  ;;  %v2705_v51 = vunpack.i.l.bf16 %v3848_v14 }
  0xe4   : > { %2993 = vrot.lane.b32.xlu0 %v3754_v32, %s3239_s10  ;;  %v3883_v16 = vpack.i.bf16 %v556_v63, %v554_v56  ;;  %v1513_v2 = vsel %vm1502_vm6, %v1480_v42, %v2710_v34  ;;  %v1514_v48 = vsel %vm1502_vm6, %v1481_v43, %v2711_v41  ;;  %v736_v28 = vsel %vm658_vm2, %v734_v62, %v735_v4 }
  0xe5   : > { %v3854_v27 = vpop.permute.xlu1 %2718  ;;  %v1512_v22 = vsel %vm1502_vm6, %v1479_v3, %v2706_v38 }
  0xe6   : > { %v3864_v57 = vpop.permute.xlu0 %2713  ;;  %v2720_v56 = vunpack.i.l.bf16 %v3854_v27 }
  0xe7   : > { %3008 = vrot.lane.b32.xlu1 %v3821_v55, %s3233_s25  ;;  %v2716_v12 = vunpack.i.h.bf16 %v3864_v57  ;;  %v2715_v47 = vunpack.i.l.bf16 %v3864_v57  ;;  %v2721_v57 = vunpack.i.h.bf16 %v3854_v27 }
  0xe8   : > { %3003 = vrot.lane.b32.xlu0 %v3856_v0, %s3239_s10 }
  0xe9   : > { %v3875_v13 = vpop.permute.xlu1 %2728  ;;  %v1545_v1 = vsel %vm1535_vm7, %v1512_v22, %v2716_v12  ;;  %v1547_v25 = vsel %vm1535_vm7, %v1514_v48, %v2721_v57  ;;  %v428_v12 = vld [vmem:[#allocation2 + $0x188] sm:$0xff] }
  0xea   : > { %v3879_v54 = vpop.permute.xlu0 %2723  ;;  %v2731_v11 = vunpack.i.h.bf16 %v3875_v13  ;;  %v2730_v10 = vunpack.i.l.bf16 %v3875_v13  ;;  %v935_v48 = vrot.slane %v428_v12, 1  ;;  %v432_v57 = vld [vmem:[#allocation2 + $0x1a8] sm:$0x3] }
  0xeb   : > { %3018 = vrot.lane.b32.xlu1 %v3856_v0, %s3232_s24  ;;  %v2726_v5 = vunpack.i.h.bf16 %v3879_v54  ;;  %v2725_v7 = vunpack.i.l.bf16 %v3879_v54 }
  0xec   : > { %3013 = vrot.lane.b32.xlu0 %v3754_v32, %s3232_s24  ;;  %v3911_v32 = vpack.i.bf16 %v561_v20, %v559_v19 }
  0xed   : > { %v3897_v30 = vpop.permute.xlu1 %2738  ;;  %v1578_v17 = vsel %vm1568_vm8, %v1545_v1, %v2726_v5 }
  0xee   : > { %v2734_v9 = vpop.permute.xlu0 %2733  ;;  %v2741_v27 = vunpack.i.h.bf16 %v3897_v30  ;;  %v2740_v59 = vunpack.i.l.bf16 %v3897_v30  ;;  %v1546_v30 = vsel %vm1535_vm7, %v1513_v2, %v2720_v56 }
  0xef   : > { %3028 = vrot.lane.b32.xlu1 %v3877_v15, %s3234_s26  ;;  %v2736_v49 = vunpack.i.h.bf16 %v2734_v9  ;;  %v2735_v50 = vunpack.i.l.bf16 %v2734_v9  ;;  %v1579_v34 = vsel %vm1568_vm8, %v1546_v30, %v2730_v10  ;;  %v1580_v9 = vsel %vm1568_vm8, %v1547_v25, %v2731_v11 }
  0xf0   : > { %3023 = vrot.lane.b32.xlu0 %v3742_v21, %s3234_s26  ;;  %v1511_v21 = vsel %vm1502_vm6, %v1478_v44, %v2705_v51  ;;  %v1613_v36 = vsel %vm1601_vm9, %v1580_v9, %v2741_v27 }
  0xf1   : > { %v2749_v6 = vpop.permute.xlu1 %2748  ;;  %v1544_v63 = vsel %vm1535_vm7, %v1511_v21, %v2715_v47  ;;  %v1611_v18 = vsel %vm1601_vm9, %v1578_v17, %v2736_v49  ;;  %v429_v47 = vld [vmem:[#allocation2 + $0x190] sm:$0x3]  ;;  %v1036_v21 = vrot.slane %v428_v12, 2  ;;  %v3996_v49 = vld [vmem:[#allocation2 + $0x198] sm:$0xff]  ;;  %v1238_v17 = vrot.slane %v432_v57, 1 }
  0xf2   : > { %v2744_v14 = vpop.permute.xlu0 %2743  ;;  %v1577_v54 = vsel %vm1568_vm8, %v1544_v63, %v2725_v7  ;;  %v2751_v8 = vunpack.i.h.bf16 %v2749_v6  ;;  %v2750_v13 = vunpack.i.l.bf16 %v2749_v6  ;;  %v737_v6 = vrot.slane %v3862_v53, 2 }
  0xf3   : > { %3038 = vrot.lane.b32.xlu1 %v3883_v16, %s3236_s30  ;;  %v2746_v58 = vunpack.i.h.bf16 %v2744_v14  ;;  %v2745_v46 = vunpack.i.l.bf16 %v2744_v14  ;;  %v937_v7 = vrot.slane %v429_v47, 1  ;;  %v1038_v22 = vrot.slane %v429_v47, 2 }
  0xf4   : > { %3033 = vrot.lane.b32.xlu0 %v3821_v55, %s3236_s30  ;;  %v1610_v55 = vsel %vm1601_vm9, %v1577_v54, %v2735_v50  ;;  %v1646_v39 = vsel %vm1634_vm10, %v1613_v36, %v2751_v8  ;;  %v738_v53 = vsel %vm658_vm2, %v735_v4, %v737_v6  ;;  %v3998_v50 = vld [vmem:[#allocation2 + $0x1a0] sm:$0xff]  ;;  %v1235_v63 = vrot.slane %v3996_v49, 1 }
  0xf5   : > { %v3939_v60 = vpop.permute.xlu1 %2758  ;;  %v1643_v23 = vsel %vm1634_vm10, %v1610_v55, %v2745_v46  ;;  %v1644_v24 = vsel %vm1634_vm10, %v1611_v18, %v2746_v58  ;;  %v4004_v58 = vpack.i.bf16 %v738_v53, %v736_v28  ;;  %v938_v11 = vsel %vm481_vm3, %v935_v48, %v937_v7 }
  0xf6   : > { %v2754_v45 = vpop.permute.xlu0 %2753  ;;  %v1039_v54 = vsel %vm658_vm2, %v1036_v21, %v1038_v22  ;;  %v1336_v8 = vrot.slane %v3996_v49, 2  ;;  %v3137_v25 = vpack.i.bf16 %v3998_v50, %v3996_v49 }
  0xf7   : > { %3048 = vrot.lane.b32.xlu1 %v3901_v31, %s3237_s8  ;;  %v2756_v19 = vunpack.i.h.bf16 %v2754_v45  ;;  %v2755_v20 = vunpack.i.l.bf16 %v2754_v45 }
  0xf8   : > { %3043 = vrot.lane.b32.xlu0 %v3856_v0, %s3237_s8  ;;  %v1612_v0 = vsel %vm1601_vm9, %v1579_v34, %v2740_v59 }
  0xf9   : > { %v3957_v29 = vpop.permute.xlu1 %2768  ;;  %v1676_v26 = vsel %vm1667_vm11, %v1643_v23, %v2755_v20  ;;  %v1677_v41 = vsel %vm1667_vm11, %v1644_v24, %v2756_v19  ;;  %v1645_v51 = vsel %vm1634_vm10, %v1612_v0, %v2750_v13  ;;  %v1337_v20 = vrot.slane %v3998_v50, 2 }
  0xfa   : > { %v1704_v61 = vpack.c.bf16 %v1677_v41, %v1676_v26  ;;  %v2764_v35 = vpop.permute.xlu0 %2763  ;;  %v1339_v23 = vrot.slane %v432_v57, 2  ;;  %v2771_v24 = vunpack.i.h.bf16 %v3957_v29  ;;  %v2770_v30 = vunpack.i.l.bf16 %v3957_v29 }
  0xfb   : > { %3058 = vrot.lane.b32.xlu1 %v3905_v33, %s3235_s27  ;;  %v2766_v37 = vunpack.i.h.bf16 %v2764_v35  ;;  %v2765_v38 = vunpack.i.l.bf16 %v2764_v35  ;;  %v2761_v26 = vunpack.i.h.bf16 %v3939_v60  ;;  %v2760_v41 = vunpack.i.l.bf16 %v3939_v60 }
  0xfc   : > { %3053 = vrot.lane.b32.xlu0 %v3877_v15, %s3235_s27  ;;  %2445 = vmatprep.mubr.msk.bf16.mxu0 %vm1743_vm12, %v1704_v61  ;;  %v427_v15 = vld [vmem:[#allocation2 + $0x180] sm:$0xff] }
  0xfd   : > { %v3974_v40 = vpop.permute.xlu1 %2778  ;;  %v1679_v42 = vsel %vm1667_vm11, %v1646_v39, %v2766_v37  ;;  %v1678_v43 = vsel %vm1667_vm11, %v1645_v51, %v2765_v38  ;;  %v934_v2 = vrot.slane %v427_v15, 1  ;;  %v1035_v14 = vrot.slane %v427_v15, 2  ;;  %v3171_v51 = vld [vmem:[#allocation2 + $0xb0] sm:$0xff] }
  0xfe   : > { %v1705_v3 = vpack.c.bf16 %v1679_v42, %v1678_v43  ;;  %v3981_v44 = vpop.permute.xlu0 %2773  ;;  %v4020_v59 = vpack.i.bf16 %v428_v12, %v427_v15  ;;  %v2781_v34 = vunpack.i.h.bf16 %v3974_v40  ;;  %v2780_v9 = vunpack.i.l.bf16 %v3974_v40  ;;  %v3172_v40 = vld [vmem:[#allocation2 + $0xa8] sm:$0xff]  ;;  %v3173_v43 = vld [vmem:[#allocation2 + $0x98] sm:$0xff] }
  0xff   : > { %3068 = vrot.lane.b32.xlu1 %v3911_v32, %s3238_s9  ;;  %v936_v46 = vsel %vm481_vm3, %v934_v2, %v935_v48  ;;  %v1037_v10 = vsel %vm658_vm2, %v1035_v14, %v1036_v21  ;;  %v2776_v35 = vunpack.i.h.bf16 %v3981_v44  ;;  %v2775_v29 = vunpack.i.l.bf16 %v3981_v44 }
 0x100   : > { %3063 = vrot.lane.b32.xlu0 %v3883_v16, %s3238_s9  ;;  %2446 = vmatmul.mubr.msk.bf16.gmra.mrb[8].mxu0 %vm1743_vm12, %v1705_v3  ;;  %v4022_v45 = vpack.i.bf16 %v938_v11, %v936_v46  ;;  %v4024_v55 = vpack.i.bf16 %v1039_v54, %v1037_v10  ;;  %v4059_v38 = vsel %vm658_vm2, %v1336_v8, %v1337_v20  ;;  %v3174_v3 = vld [vmem:[#allocation2 + $0x90] sm:$0xff] }
 0x101   : > { %v3988_v52 = vpop.permute.xlu1 %2788  ;;  %v1452_v39 = vsel %vm258_vm0, %v3171_v51, %v2771_v24  ;;  %v1451_v62 = vsel %vm258_vm0, %v3172_v40, %v2770_v30  ;;  %v1450_v6 = vsel %vm258_vm0, %v3173_v43, %v2761_v26  ;;  %v1449_v44 = vsel %vm258_vm0, %v3174_v3, %v2760_v41 }
 0x102   : > { %v3992_v5 = vpop.permute.xlu0 %2783  ;;  %v2791_v36 = vunpack.i.h.bf16 %v3988_v52  ;;  %v2790_v60 = vunpack.i.l.bf16 %v3988_v52  ;;  %v1484_v15 = vsel %vm1469_vm5, %v1451_v62, %v2780_v9  ;;  %v1485_v12 = vsel %vm1469_vm5, %v1452_v39, %v2781_v34 }
 0x103   : > { %3078 = vrot.lane.b32.xlu1 %v3883_v16, %s3233_s25  ;;  %v1236_v16 = vrot.slane %v3998_v50, 1  ;;  %v2786_v4 = vunpack.i.h.bf16 %v3992_v5  ;;  %v2785_v42 = vunpack.i.l.bf16 %v3992_v5  ;;  %v1483_v52 = vsel %vm1469_vm5, %v1450_v6, %v2776_v35 }
 0x104   : > { %3073 = vrot.lane.b32.xlu0 %v3901_v31, %s3239_s10  ;;  %v1482_v28 = vsel %vm1469_vm5, %v1449_v44, %v2775_v29  ;;  %v1517_v48 = vsel %vm1502_vm6, %v1484_v15, %v2790_v60  ;;  %v1518_v5 = vsel %vm1502_vm6, %v1485_v12, %v2791_v36 }
 0x105   : > { %v4002_v56 = vpop.permute.xlu1 %2798  ;;  %v4027_v18 = vsel %vm481_vm3, %v1235_v63, %v1236_v16  ;;  %v4036_v13 = vsel %vm481_vm3, %v1236_v16, %v1238_v17  ;;  %v1516_v22 = vsel %vm1502_vm6, %v1483_v52, %v2786_v4 }
 0x106   : > { %v4009_v1 = vpop.permute.xlu0 %2793  ;;  %v3147_v0 = vpack.i.bf16 %v4036_v13, %v4027_v18  ;;  %v2801_v16 = vunpack.i.h.bf16 %v4002_v56  ;;  %v2800_v63 = vunpack.i.l.bf16 %v4002_v56 }
 0x107   : > { %3088 = vrot.lane.b32.xlu1 %v3911_v32, %s3233_s25  ;;  %v2796_v53 = vunpack.i.h.bf16 %v4009_v1  ;;  %v2795_v2 = vunpack.i.l.bf16 %v4009_v1  ;;  %s4385_s25 = scalar_lea.vmem %s4525_s5, %s2393_s20 }
 0x108   : > { %3083 = vrot.lane.b32.xlu0 %v4004_v58, %s3239_s10  ;;  %v1550_v36 = vsel %vm1535_vm7, %v1517_v48, %v2800_v63  ;;  %v1551_v60 = vsel %vm1535_vm7, %v1518_v5, %v2801_v16  ;;  %v3176_v63 = vld [vmem:[#allocation2 + $0xd8] sm:$0xff] }
 0x109   : > { %v4018_v27 = vpop.permute.xlu1 %2808  ;;  %v1549_v17 = vsel %vm1535_vm7, %v1516_v22, %v2796_v53 }
 0x10a   : > { %v4029_v19 = vpop.permute.xlu0 %2803 }
 0x10b   : > { %3098 = vrot.lane.b32.xlu1 %v4004_v58, %s3232_s24  ;;  %v2806_v7 = vunpack.i.h.bf16 %v4029_v19  ;;  %v2805_v14 = vunpack.i.l.bf16 %v4029_v19  ;;  %v2811_v19 = vunpack.i.h.bf16 %v4018_v27 }
 0x10c   : > { %3093 = vrot.lane.b32.xlu0 %v3901_v31, %s3232_s24  ;;  %v4062_v31 = vsel %vm658_vm2, %v1337_v20, %v1339_v23  ;;  %v2810_v20 = vunpack.i.l.bf16 %v4018_v27 }
 0x10d   : > { %v4048_v61 = vpop.permute.xlu1 %2818  ;;  %v1582_v23 = vsel %vm1568_vm8, %v1549_v17, %v2806_v7  ;;  %v1584_v40 = vsel %vm1568_vm8, %v1551_v60, %v2811_v19  ;;  %v3177_v17 = vld [vmem:[#allocation2 + $0xc8] sm:$0xff]  ;;  %v3178_v19 = vld [vmem:[#allocation2 + $0xc0] sm:$0xff] }
 0x10e   : > { %v2814_v37 = vpop.permute.xlu0 %2813  ;;  %v2821_v56 = vunpack.i.h.bf16 %v4048_v61  ;;  %v2820_v24 = vunpack.i.l.bf16 %v4048_v61  ;;  %v1583_v39 = vsel %vm1568_vm8, %v1550_v36, %v2810_v20 }
 0x10f   : > { %3108 = vrot.lane.b32.xlu1 %v4020_v59, %s3234_s26  ;;  %v2816_v57 = vunpack.i.h.bf16 %v2814_v37  ;;  %v2815_v46 = vunpack.i.l.bf16 %v2814_v37 }
 0x110   : > { %3103 = vrot.lane.b32.xlu0 %v3905_v33, %s3234_s26  ;;  %v1515_v33 = vsel %vm1502_vm6, %v1482_v28, %v2785_v42  ;;  %v1616_v42 = vsel %vm1601_vm9, %v1583_v39, %v2820_v24  ;;  %v1617_v43 = vsel %vm1601_vm9, %v1584_v40, %v2821_v56  ;;  %v3157_v28 = vpack.i.bf16 %v4062_v31, %v4059_v38 }
 0x111   : > { %v2829_v47 = vpop.permute.xlu1 %2828  ;;  %v1548_v54 = vsel %vm1535_vm7, %v1515_v33, %v2795_v2  ;;  %v1615_v26 = vsel %vm1601_vm9, %v1582_v23, %v2816_v57 }
 0x112   : > { %v2824_v21 = vpop.permute.xlu0 %2823  ;;  %v1581_v8 = vsel %vm1568_vm8, %v1548_v54, %v2805_v14  ;;  %v2831_v9 = vunpack.i.h.bf16 %v2829_v47  ;;  %v2830_v27 = vunpack.i.l.bf16 %v2829_v47 }
 0x113   : > { %3118 = vrot.lane.b32.xlu1 %v4022_v45, %s3236_s30  ;;  %v2826_v1 = vunpack.i.h.bf16 %v2824_v21  ;;  %v2825_v11 = vunpack.i.l.bf16 %v2824_v21 }
 0x114   : > { %3113 = vrot.lane.b32.xlu0 %v3911_v32, %s3236_s30  ;;  %v1614_v32 = vsel %vm1601_vm9, %v1581_v8, %v2815_v46  ;;  %v1649_v44 = vsel %vm1634_vm10, %v1616_v42, %v2830_v27  ;;  %v1650_v15 = vsel %vm1634_vm10, %v1617_v43, %v2831_v9  ;;  %v3175_v46 = vld [vmem:[#allocation2 + $0xe0] sm:$0xff] }
 0x115   : > { %v4090_v10 = vpop.permute.xlu1 %2838  ;;  %v1647_v35 = vsel %vm1634_vm10, %v1614_v32, %v2825_v11  ;;  %v1648_v29 = vsel %vm1634_vm10, %v1615_v26, %v2826_v1 }
 0x116   : > { %v2834_v30 = vpop.permute.xlu0 %2833  ;;  %v2841_v31 = vunpack.i.h.bf16 %v4090_v10 }
 0x117   : > { %3128 = vrot.lane.b32.xlu1 %v4024_v55, %s3237_s8  ;;  %v2836_v41 = vunpack.i.h.bf16 %v2834_v30  ;;  %v2835_v34 = vunpack.i.l.bf16 %v2834_v30 }
 0x118   : > { %3123 = vrot.lane.b32.xlu0 %v4004_v58, %s3237_s8  ;;  %v2005_v58 = vld [vmem:[%s4523_s3] sm:$0xf] }
 0x119   : > { %v2849_v61 = vpop.permute.xlu1 %2848  ;;  %v1680_v37 = vsel %vm1667_vm11, %v1647_v35, %v2835_v34  ;;  %v1681_v51 = vsel %vm1667_vm11, %v1648_v29, %v2836_v41  ;;  %2504 = vmatprep.subr.msk.bf16.mxu1 %vm2061_vm13, %v2005_v58  ;;  %v2063_v50 = vsel %vm2061_vm13, %v2005_v58, 0 }
 0x11a   : > { %v1706_v62 = vpack.c.bf16 %v1681_v51, %v1680_v37  ;;  %v2844_v4 = vpop.permute.xlu0 %2843  ;;  %2470 = vmatpush3.bf16.msra.mxu1 %v2063_v50  ;;  %v2850_v38 = vunpack.i.l.bf16 %v2849_v61 }
 0x11b   : > { %3138 = vrot.lane.b32.xlu1 %v3137_v25, %s3235_s27  ;;  %v2846_v6 = vunpack.i.h.bf16 %v2844_v4  ;;  %v2845_v3 = vunpack.i.l.bf16 %v2844_v4 }
 0x11c   : > { %3133 = vrot.lane.b32.xlu0 %v4020_v59, %s3235_s27  ;;  %2449 = vmatprep.mubr.msk.bf16.mxu0 %vm1743_vm12, %v1706_v62  ;;  %v1455_v1 = vsel %vm258_vm0, %v3176_v63, %v2850_v38 }
 0x11d   : > { %v2859_v49 = vpop.permute.xlu1 %2858  ;;  %v1683_v25 = vsel %vm1667_vm11, %v1650_v15, %v2846_v6  ;;  %v1682_v12 = vsel %vm1667_vm11, %v1649_v44, %v2845_v3 }
 0x11e   : > { %v1707_v47 = vpack.c.bf16 %v1683_v25, %v1682_v12  ;;  %v2854_v52 = vpop.permute.xlu0 %2853  ;;  %v2861_v5 = vunpack.i.h.bf16 %v2859_v49  ;;  %v2860_v7 = vunpack.i.l.bf16 %v2859_v49 }
 0x11f   : > { %3148 = vrot.lane.b32.xlu1 %v3147_v0, %s3238_s9  ;;  %v2851_v0 = vunpack.i.h.bf16 %v2849_v61  ;;  %v2856_v21 = vunpack.i.h.bf16 %v2854_v52  ;;  %v2855_v33 = vunpack.i.l.bf16 %v2854_v52 }
 0x120   : > { %3143 = vrot.lane.b32.xlu0 %v4022_v45, %s3238_s9  ;;  %2450 = vmatmul.mubr.msk.bf16.gmra.mrb[12].mxu0 %vm1743_vm12, %v1707_v47  ;;  %v2840_v45 = vunpack.i.l.bf16 %v4090_v10  ;;  %v1454_v10 = vsel %vm258_vm0, %v3177_v17, %v2841_v31  ;;  %v1488_v8 = vsel %vm1469_vm5, %v1455_v1, %v2860_v7 }
 0x121   : > { %v2869_v59 = vpop.permute.xlu1 %2868  ;;  %v1456_v16 = vsel %vm258_vm0, %v3175_v46, %v2851_v0  ;;  %v1487_v24 = vsel %vm1469_vm5, %v1454_v10, %v2856_v21 }
 0x122   : > { %v2864_v53 = vpop.permute.xlu0 %2863  ;;  %v2871_v22 = vunpack.i.h.bf16 %v2869_v59  ;;  %v1453_v20 = vsel %vm258_vm0, %v3178_v19, %v2840_v45  ;;  %v1489_v23 = vsel %vm1469_vm5, %v1456_v16, %v2861_v5 }
 0x123   : > { %3158 = vrot.lane.b32.xlu1 %v3157_v28, %s3239_s10  ;;  %v2866_v11 = vunpack.i.h.bf16 %v2864_v53  ;;  %v2865_v54 = vunpack.i.l.bf16 %v2864_v53  ;;  %v1486_v30 = vsel %vm1469_vm5, %v1453_v20, %v2855_v33 }
 0x124   : > { %3153 = vrot.lane.b32.xlu0 %v4024_v55, %s3239_s10  ;;  %v2870_v55 = vunpack.i.l.bf16 %v2869_v59  ;;  %v1522_v34 = vsel %vm1502_vm6, %v1489_v23, %v2871_v22 }
 0x125   : > { %v4142_v2 = vpop.permute.xlu1 %2878  ;;  %v1519_v29 = vsel %vm1502_vm6, %v1486_v30, %v2865_v54  ;;  %v1520_v61 = vsel %vm1502_vm6, %v1487_v24, %v2866_v11 }
 0x126   : > { %v2874_v48 = vpop.permute.xlu0 %2873  ;;  %v1521_v41 = vsel %vm1502_vm6, %v1488_v8, %v2870_v55  ;;  %v2881_v37 = vunpack.i.h.bf16 %v4142_v2  ;;  %v2880_v51 = vunpack.i.l.bf16 %v4142_v2 }
 0x127   : > { %v2876_v32 = vunpack.i.h.bf16 %v2874_v48  ;;  %v2875_v26 = vunpack.i.l.bf16 %v2874_v48 }
 0x128   : > { %v1554_v48 = vsel %vm1535_vm7, %v1521_v41, %v2880_v51 }
 0x129   : > { %v4144_v18 = vpop.permute.xlu1 %2888  ;;  %v1552_v4 = vsel %vm1535_vm7, %v1519_v29, %v2875_v26  ;;  %v1553_v58 = vsel %vm1535_vm7, %v1520_v61, %v2876_v32  ;;  %v3179_v29 = vld [vmem:[#allocation2 + $0x110] sm:$0xff] }
 0x12a   : > { %v2884_v13 = vpop.permute.xlu0 %2883  ;;  %v2891_v42 = vunpack.i.h.bf16 %v4144_v18  ;;  %v2890_v43 = vunpack.i.l.bf16 %v4144_v18  ;;  %v1555_v18 = vsel %vm1535_vm7, %v1522_v34, %v2881_v37 }
 0x12b   : > { %v2886_v9 = vunpack.i.h.bf16 %v2884_v13  ;;  %v2885_v27 = vunpack.i.l.bf16 %v2884_v13 }
 0x12c   : > { %v1587_v38 = vsel %vm1568_vm8, %v1554_v48, %v2890_v43  ;;  %v1588_v31 = vsel %vm1568_vm8, %v1555_v18, %v2891_v42 }
 0x12d   : > { %v4148_v14 = vpop.permute.xlu1 %2898  ;;  %v1585_v6 = vsel %vm1568_vm8, %v1552_v4, %v2885_v27  ;;  %v1586_v3 = vsel %vm1568_vm8, %v1553_v58, %v2886_v9 }
 0x12e   : > { %v2894_v57 = vpop.permute.xlu0 %2893  ;;  %v2901_v44 = vunpack.i.h.bf16 %v4148_v14  ;;  %v2900_v15 = vunpack.i.l.bf16 %v4148_v14 }
 0x12f   : > { %v2896_v36 = vunpack.i.h.bf16 %v2894_v57  ;;  %v2895_v60 = vunpack.i.l.bf16 %v2894_v57 }
 0x130   : > { %v1620_v7 = vsel %vm1601_vm9, %v1587_v38, %v2900_v15  ;;  %v1621_v14 = vsel %vm1601_vm9, %v1588_v31, %v2901_v44 }
 0x131   : > { %v2909_v56 = vpop.permute.xlu1 %2908  ;;  %v1618_v50 = vsel %vm1601_vm9, %v1585_v6, %v2895_v60  ;;  %v1619_v25 = vsel %vm1601_vm9, %v1586_v3, %v2896_v36  ;;  %v3180_v36 = vld [vmem:[#allocation2 + $0x108] sm:$0xff] }
 0x132   : > { %v2904_v35 = vpop.permute.xlu0 %2903  ;;  %v2911_v52 = vunpack.i.h.bf16 %v2909_v56  ;;  %v2910_v28 = vunpack.i.l.bf16 %v2909_v56 }
 0x133   : > { %v2906_v39 = vunpack.i.h.bf16 %v2904_v35  ;;  %v2905_v40 = vunpack.i.l.bf16 %v2904_v35 }
 0x134   : > { %v1653_v22 = vsel %vm1634_vm10, %v1620_v7, %v2910_v28  ;;  %v1654_v55 = vsel %vm1634_vm10, %v1621_v14, %v2911_v52 }
 0x135   : > { %v4164_v62 = vpop.permute.xlu1 %2918  ;;  %v1651_v59 = vsel %vm1634_vm10, %v1618_v50, %v2905_v40  ;;  %v1652_v53 = vsel %vm1634_vm10, %v1619_v25, %v2906_v39  ;;  %v3181_v39 = vld [vmem:[#allocation2 + $0xf8] sm:$0xff] }
 0x136   : > { %v2914_v49 = vpop.permute.xlu0 %2913  ;;  %v2921_v56 = vunpack.i.h.bf16 %v4164_v62  ;;  %v2920_v24 = vunpack.i.l.bf16 %v4164_v62  ;;  %v3182_v62 = vld [vmem:[#allocation2 + $0xf0] sm:$0xff] }
 0x137   : > { %v2916_v12 = vunpack.i.h.bf16 %v2914_v49  ;;  %v2915_v47 = vunpack.i.l.bf16 %v2914_v49 }
 0x138   : > { %v1458_v40 = vsel %vm258_vm0, %v3181_v39, %v2921_v56  ;;  %v1457_v4 = vsel %vm258_vm0, %v3182_v62, %v2920_v24 }
 0x139   : > { %v2929_v2 = vpop.permute.xlu1 %2928  ;;  %v1684_v13 = vsel %vm1667_vm11, %v1651_v59, %v2915_v47  ;;  %v1685_v0 = vsel %vm1667_vm11, %v1652_v53, %v2916_v12 }
 0x13a   : > { %v1708_v45 = vpack.c.bf16 %v1685_v0, %v1684_v13  ;;  %v2924_v5 = vpop.permute.xlu0 %2923  ;;  %v2931_v8 = vunpack.i.h.bf16 %v2929_v2  ;;  %v2930_v23 = vunpack.i.l.bf16 %v2929_v2 }
 0x13b   : > { %v2926_v21 = vunpack.i.h.bf16 %v2924_v5  ;;  %v2925_v33 = vunpack.i.l.bf16 %v2924_v5 }
 0x13c   : > { %2453 = vmatprep.mubr.msk.bf16.mxu0 %vm1743_vm12, %v1708_v45  ;;  %v1460_v61 = vsel %vm258_vm0, %v3179_v29, %v2931_v8  ;;  %v1459_v60 = vsel %vm258_vm0, %v3180_v36, %v2930_v23 }
 0x13d   : > { %v2939_v57 = vpop.permute.xlu1 %2938  ;;  %v1687_v46 = vsel %vm1667_vm11, %v1654_v55, %v2926_v21  ;;  %v1686_v16 = vsel %vm1667_vm11, %v1653_v22, %v2925_v33 }
 0x13e   : > { %v1709_v63 = vpack.c.bf16 %v1687_v46, %v1686_v16  ;;  %v2934_v1 = vpop.permute.xlu0 %2933  ;;  %v2941_v30 = vunpack.i.h.bf16 %v2939_v57  ;;  %v2940_v32 = vunpack.i.l.bf16 %v2939_v57 }
 0x13f   : > { %v2936_v41 = vunpack.i.h.bf16 %v2934_v1  ;;  %v2935_v34 = vunpack.i.l.bf16 %v2934_v1 }
 0x140   : > { %2454 = vmatmul.mubr.msk.bf16.gmra.mrb[16].mxu0 %vm1743_vm12, %v1709_v63  ;;  %v1492_v58 = vsel %vm1469_vm5, %v1459_v60, %v2940_v32  ;;  %v1493_v42 = vsel %vm1469_vm5, %v1460_v61, %v2941_v30 }
 0x141   : > { %v2949_v11 = vpop.permute.xlu1 %2948  ;;  %v1491_v6 = vsel %vm1469_vm5, %v1458_v40, %v2936_v41  ;;  %v1490_v3 = vsel %vm1469_vm5, %v1457_v4, %v2935_v34 }
 0x142   : > { %v2944_v54 = vpop.permute.xlu0 %2943  ;;  %v2951_v9 = vunpack.i.h.bf16 %v2949_v11  ;;  %v2950_v27 = vunpack.i.l.bf16 %v2949_v11 }
 0x143   : > { %v2946_v37 = vunpack.i.h.bf16 %v2944_v54  ;;  %v2945_v51 = vunpack.i.l.bf16 %v2944_v54 }
 0x144   : > { %v1525_v49 = vsel %vm1502_vm6, %v1492_v58, %v2950_v27  ;;  %v1526_v50 = vsel %vm1502_vm6, %v1493_v42, %v2951_v9 }
 0x145   : > { %v4192_v17 = vpop.permute.xlu1 %2958  ;;  %v1523_v52 = vsel %vm1502_vm6, %v1490_v3, %v2945_v51  ;;  %v1524_v28 = vsel %vm1502_vm6, %v1491_v6, %v2946_v37 }
 0x146   : > { %v2954_v10 = vpop.permute.xlu0 %2953  ;;  %v2961_v2 = vunpack.i.h.bf16 %v4192_v17  ;;  %v2960_v48 = vunpack.i.l.bf16 %v4192_v17 }
 0x147   : > { %v2956_v44 = vunpack.i.h.bf16 %v2954_v10  ;;  %v2955_v15 = vunpack.i.l.bf16 %v2954_v10 }
 0x148   : > { %v1558_v10 = vsel %vm1535_vm7, %v1525_v49, %v2960_v48 }
 0x149   : > { %v4194_v19 = vpop.permute.xlu1 %2968  ;;  %v1556_v38 = vsel %vm1535_vm7, %v1523_v52, %v2955_v15  ;;  %v1557_v31 = vsel %vm1535_vm7, %v1524_v28, %v2956_v44  ;;  %v3183_v52 = vld [vmem:[#allocation2 + $0x140] sm:$0xff] }
 0x14a   : > { %v2964_v20 = vpop.permute.xlu0 %2963  ;;  %v2971_v45 = vunpack.i.h.bf16 %v4194_v19  ;;  %v2970_v5 = vunpack.i.l.bf16 %v4194_v19  ;;  %v1559_v19 = vsel %vm1535_vm7, %v1526_v50, %v2961_v2 }
 0x14b   : > { %v2966_v25 = vunpack.i.h.bf16 %v2964_v20  ;;  %v2965_v12 = vunpack.i.l.bf16 %v2964_v20 }
 0x14c   : > { %v1591_v23 = vsel %vm1568_vm8, %v1558_v10, %v2970_v5  ;;  %v1592_v56 = vsel %vm1568_vm8, %v1559_v19, %v2971_v45 }
 0x14d   : > { %v4198_v26 = vpop.permute.xlu1 %2978  ;;  %v1589_v7 = vsel %vm1568_vm8, %v1556_v38, %v2965_v12  ;;  %v1590_v14 = vsel %vm1568_vm8, %v1557_v31, %v2966_v25 }
 0x14e   : > { %v2974_v35 = vpop.permute.xlu0 %2973  ;;  %v2981_v21 = vunpack.i.h.bf16 %v4198_v26  ;;  %v2980_v33 = vunpack.i.l.bf16 %v4198_v26 }
 0x14f   : > { %v2976_v59 = vunpack.i.h.bf16 %v2974_v35  ;;  %v2975_v53 = vunpack.i.l.bf16 %v2974_v35 }
 0x150   : > { %v1624_v32 = vsel %vm1601_vm9, %v1591_v23, %v2980_v33  ;;  %v1625_v26 = vsel %vm1601_vm9, %v1592_v56, %v2981_v21 }
 0x151   : > { %v2989_v43 = vpop.permute.xlu1 %2988  ;;  %v1622_v55 = vsel %vm1601_vm9, %v1589_v7, %v2975_v53  ;;  %v1623_v57 = vsel %vm1601_vm9, %v1590_v14, %v2976_v59  ;;  %v3184_v59 = vld [vmem:[#allocation2 + $0x138] sm:$0xff] }
 0x152   : > { %v2984_v47 = vpop.permute.xlu0 %2983  ;;  %v2991_v63 = vunpack.i.h.bf16 %v2989_v43  ;;  %v2990_v1 = vunpack.i.l.bf16 %v2989_v43 }
 0x153   : > { %v2986_v18 = vunpack.i.h.bf16 %v2984_v47  ;;  %v2985_v13 = vunpack.i.l.bf16 %v2984_v47 }
 0x154   : > { %v1657_v9 = vsel %vm1634_vm10, %v1624_v32, %v2990_v1  ;;  %v1658_v27 = vsel %vm1634_vm10, %v1625_v26, %v2991_v63 }
 0x155   : > { %v4214_v0 = vpop.permute.xlu1 %2998  ;;  %v1655_v11 = vsel %vm1634_vm10, %v1622_v55, %v2985_v13  ;;  %v1656_v54 = vsel %vm1634_vm10, %v1623_v57, %v2986_v18  ;;  %v3185_v18 = vld [vmem:[#allocation2 + $0x128] sm:$0xff] }
 0x156   : > { %v2994_v22 = vpop.permute.xlu0 %2993  ;;  %v3001_v43 = vunpack.i.h.bf16 %v4214_v0  ;;  %v3000_v6 = vunpack.i.l.bf16 %v4214_v0  ;;  %v3186_v0 = vld [vmem:[#allocation2 + $0x120] sm:$0xff] }
 0x157   : > { %v2996_v46 = vunpack.i.h.bf16 %v2994_v22  ;;  %v2995_v16 = vunpack.i.l.bf16 %v2994_v22 }
 0x158   : > { %v1462_v13 = vsel %vm258_vm0, %v3185_v18, %v3001_v43  ;;  %v1461_v38 = vsel %vm258_vm0, %v3186_v0, %v3000_v6 }
 0x159   : > { %v3009_v17 = vpop.permute.xlu1 %3008  ;;  %v1688_v20 = vsel %vm1667_vm11, %v1655_v11, %v2995_v16  ;;  %v1689_v8 = vsel %vm1667_vm11, %v1656_v54, %v2996_v46 }
 0x15a   : > { %v1710_v24 = vpack.c.bf16 %v1689_v8, %v1688_v20  ;;  %v3004_v30 = vpop.permute.xlu0 %3003  ;;  %v3011_v58 = vunpack.i.h.bf16 %v3009_v17  ;;  %v3010_v42 = vunpack.i.l.bf16 %v3009_v17 }
 0x15b   : > { %v3006_v41 = vunpack.i.h.bf16 %v3004_v30  ;;  %v3005_v34 = vunpack.i.l.bf16 %v3004_v30 }
 0x15c   : > { %2457 = vmatprep.mubr.msk.bf16.mxu0 %vm1743_vm12, %v1710_v24  ;;  %v1464_v28 = vsel %vm258_vm0, %v3183_v52, %v3011_v58  ;;  %v1463_v53 = vsel %vm258_vm0, %v3184_v59, %v3010_v42 }
 0x15d   : > { %v3019_v35 = vpop.permute.xlu1 %3018  ;;  %v1691_v29 = vsel %vm1667_vm11, %v1658_v27, %v3006_v41  ;;  %v1690_v61 = vsel %vm1667_vm11, %v1657_v9, %v3005_v34 }
 0x15e   : > { %v1711_v36 = vpack.c.bf16 %v1691_v29, %v1690_v61  ;;  %v3014_v60 = vpop.permute.xlu0 %3013  ;;  %v3021_v3 = vunpack.i.h.bf16 %v3019_v35  ;;  %v3020_v44 = vunpack.i.l.bf16 %v3019_v35 }
 0x15f   : > { %v3016_v49 = vunpack.i.h.bf16 %v3014_v60  ;;  %v3015_v50 = vunpack.i.l.bf16 %v3014_v60 }
 0x160   : > { %2458 = vmatmul.mubr.msk.bf16.gmra.mrb[20].mxu0 %vm1743_vm12, %v1711_v36  ;;  %v1496_v31 = vsel %vm1469_vm5, %v1463_v53, %v3020_v44  ;;  %v1497_v45 = vsel %vm1469_vm5, %v1464_v28, %v3021_v3 }
 0x161   : > { %v3029_v37 = vpop.permute.xlu1 %3028  ;;  %v1495_v7 = vsel %vm1469_vm5, %v1462_v13, %v3016_v49  ;;  %v1494_v14 = vsel %vm1469_vm5, %v1461_v38, %v3015_v50 }
 0x162   : > { %v3024_v51 = vpop.permute.xlu0 %3023  ;;  %v3031_v25 = vunpack.i.h.bf16 %v3029_v37  ;;  %v3030_v12 = vunpack.i.l.bf16 %v3029_v37 }
 0x163   : > { %v3026_v2 = vunpack.i.h.bf16 %v3024_v51  ;;  %v3025_v48 = vunpack.i.l.bf16 %v3024_v51 }
 0x164   : > { %v1529_v22 = vsel %vm1502_vm6, %v1496_v31, %v3030_v12  ;;  %v1530_v55 = vsel %vm1502_vm6, %v1497_v45, %v3031_v25 }
 0x165   : > { %v4242_v39 = vpop.permute.xlu1 %3038  ;;  %v1527_v63 = vsel %vm1502_vm6, %v1494_v14, %v3025_v48  ;;  %v1528_v1 = vsel %vm1502_vm6, %v1495_v7, %v3026_v2 }
 0x166   : > { %v3034_v40 = vpop.permute.xlu0 %3033  ;;  %v3041_v17 = vunpack.i.h.bf16 %v4242_v39  ;;  %v3040_v10 = vunpack.i.l.bf16 %v4242_v39 }
 0x167   : > { %v3036_v21 = vunpack.i.h.bf16 %v3034_v40  ;;  %v3035_v33 = vunpack.i.l.bf16 %v3034_v40 }
 0x168   : > { %v1562_v40 = vsel %vm1535_vm7, %v1529_v22, %v3040_v10 }
 0x169   : > { %v4244_v62 = vpop.permute.xlu1 %3048  ;;  %v1560_v23 = vsel %vm1535_vm7, %v1527_v63, %v3035_v33  ;;  %v1561_v56 = vsel %vm1535_vm7, %v1528_v1, %v3036_v21 }
 0x16a   : > { %v3044_v4 = vpop.permute.xlu0 %3043  ;;  %v3051_v24 = vunpack.i.h.bf16 %v4244_v62  ;;  %v3050_v30 = vunpack.i.l.bf16 %v4244_v62  ;;  %v1563_v62 = vsel %vm1535_vm7, %v1530_v55, %v3041_v17  ;;  %v3190_v17 = vld [vmem:[#allocation2 + $0x168] sm:$0xff] }
 0x16b   : > { %v3046_v57 = vunpack.i.h.bf16 %v3044_v4  ;;  %v3045_v46 = vunpack.i.l.bf16 %v3044_v4 }
 0x16c   : > { %v1595_v42 = vsel %vm1568_vm8, %v1562_v40, %v3050_v30  ;;  %v1596_v43 = vsel %vm1568_vm8, %v1563_v62, %v3051_v24 }
 0x16d   : > { %v4248_v15 = vpop.permute.xlu1 %3058  ;;  %v1593_v32 = vsel %vm1568_vm8, %v1560_v23, %v3045_v46  ;;  %v1594_v26 = vsel %vm1568_vm8, %v1561_v56, %v3046_v57  ;;  %v3187_v57 = vld [vmem:[#allocation2 + $0x158] sm:$0xff] }
 0x16e   : > { %v3054_v47 = vpop.permute.xlu0 %3053  ;;  %v3061_v41 = vunpack.i.h.bf16 %v4248_v15  ;;  %v3060_v34 = vunpack.i.l.bf16 %v4248_v15 }
 0x16f   : > { %v3056_v11 = vunpack.i.h.bf16 %v3054_v47  ;;  %v3055_v54 = vunpack.i.l.bf16 %v3054_v47 }
 0x170   : > { %v1628_v44 = vsel %vm1601_vm9, %v1595_v42, %v3060_v34  ;;  %v1629_v15 = vsel %vm1601_vm9, %v1596_v43, %v3061_v41 }
 0x171   : > { %v3069_v5 = vpop.permute.xlu1 %3068  ;;  %v1626_v27 = vsel %vm1601_vm9, %v1593_v32, %v3055_v54  ;;  %v1627_v35 = vsel %vm1601_vm9, %v1594_v26, %v3056_v11  ;;  %v3189_v11 = vld [vmem:[#allocation2 + $0x170] sm:$0xff] }
 0x172   : > { %v3064_v16 = vpop.permute.xlu0 %3063  ;;  %v3071_v36 = vunpack.i.h.bf16 %v3069_v5  ;;  %v3070_v60 = vunpack.i.l.bf16 %v3069_v5 }
 0x173   : > { %v3066_v19 = vunpack.i.h.bf16 %v3064_v16  ;;  %v3065_v20 = vunpack.i.l.bf16 %v3064_v16  ;;  %v3188_v16 = vld [vmem:[#allocation2 + $0x150] sm:$0xff] }
 0x174   : > { %v1661_v25 = vsel %vm1634_vm10, %v1628_v44, %v3070_v60  ;;  %v1662_v12 = vsel %vm1634_vm10, %v1629_v15, %v3071_v36  ;;  %v4307_v44 = vld [vmem:[%s4522_s2] ss:$0 sm:$0xff] }
 0x175   : > { %v3079_v8 = vpop.permute.xlu1 %3078  ;;  %v1659_v37 = vsel %vm1634_vm10, %v1626_v27, %v3065_v20  ;;  %v1660_v51 = vsel %vm1634_vm10, %v1627_v35, %v3066_v19 }
 0x176   : > { %v3074_v9 = vpop.permute.xlu0 %3073  ;;  %v3081_v13 = vunpack.i.h.bf16 %v3079_v8  ;;  %v3080_v0 = vunpack.i.l.bf16 %v3079_v8 }
 0x177   : > { %v3076_v29 = vunpack.i.h.bf16 %v3074_v9  ;;  %v3075_v61 = vunpack.i.l.bf16 %v3074_v9 }
 0x178   : > { %v1466_v46 = vsel %vm258_vm0, %v3187_v57, %v3081_v13  ;;  %v1465_v63 = vsel %vm258_vm0, %v3188_v16, %v3080_v0 }
 0x179   : > { %v3089_v39 = vpop.permute.xlu1 %3088  ;;  %v1692_v4 = vsel %vm1667_vm11, %v1659_v37, %v3075_v61  ;;  %v1693_v58 = vsel %vm1667_vm11, %v1660_v51, %v3076_v29 }
 0x17a   : > { %v1712_v6 = vpack.c.bf16 %v1693_v58, %v1692_v4  ;;  %v3084_v3 = vpop.permute.xlu0 %3083  ;;  %v3091_v31 = vunpack.i.h.bf16 %v3089_v39  ;;  %v3090_v45 = vunpack.i.l.bf16 %v3089_v39 }
 0x17b   : > { %v3086_v49 = vunpack.i.h.bf16 %v3084_v3  ;;  %v3085_v50 = vunpack.i.l.bf16 %v3084_v3 }
 0x17c   : > { %2461 = vmatprep.mubr.msk.bf16.mxu0 %vm1743_vm12, %v1712_v6  ;;  %v1468_v54 = vsel %vm258_vm0, %v3189_v11, %v3091_v31  ;;  %v1467_v10 = vsel %vm258_vm0, %v3190_v17, %v3090_v45 }
 0x17d   : > { %v3099_v47 = vpop.permute.xlu1 %3098  ;;  %v1695_v52 = vsel %vm1667_vm11, %v1662_v12, %v3086_v49  ;;  %v1694_v28 = vsel %vm1667_vm11, %v1661_v25, %v3085_v50 }
 0x17e   : > { %v1713_v59 = vpack.c.bf16 %v1695_v52, %v1694_v28  ;;  %v3094_v53 = vpop.permute.xlu0 %3093  ;;  %v3101_v5 = vunpack.i.h.bf16 %v3099_v47  ;;  %v3100_v7 = vunpack.i.l.bf16 %v3099_v47 }
 0x17f   : > { %v3096_v14 = vunpack.i.h.bf16 %v3094_v53  ;;  %v3095_v33 = vunpack.i.l.bf16 %v3094_v53 }
 0x180   : > { %2462 = vmatmul.mubr.msk.bf16.gmra.mrb[24].mxu0 %vm1743_vm12, %v1713_v59  ;;  %v1500_v8 = vsel %vm1469_vm5, %v1467_v10, %v3100_v7  ;;  %v1501_v23 = vsel %vm1469_vm5, %v1468_v54, %v3101_v5 }
 0x181   : > { %v3109_v2 = vpop.permute.xlu1 %3108  ;;  %v1499_v56 = vsel %vm1469_vm5, %v1466_v46, %v3096_v14  ;;  %v1498_v32 = vsel %vm1469_vm5, %v1465_v63, %v3095_v33 }
 0x182   : > { %v3104_v48 = vpop.permute.xlu0 %3103  ;;  %v3111_v22 = vunpack.i.h.bf16 %v3109_v2  ;;  %v3110_v55 = vunpack.i.l.bf16 %v3109_v2 }
 0x183   : > { %v3106_v19 = vunpack.i.h.bf16 %v3104_v48  ;;  %v3105_v20 = vunpack.i.l.bf16 %v3104_v48 }
 0x184   : > { %v1533_v26 = vsel %vm1502_vm6, %v1500_v8, %v3110_v55  ;;  %v1534_v41 = vsel %vm1502_vm6, %v1501_v23, %v3111_v22 }
 0x185   : > { %v3119_v18 = vpop.permute.xlu1 %3118  ;;  %v1531_v36 = vsel %vm1502_vm6, %v1498_v32, %v3105_v20  ;;  %v1532_v60 = vsel %vm1502_vm6, %v1499_v56, %v3106_v19 }
 0x186   : > { %v3114_v38 = vpop.permute.xlu0 %3113  ;;  %v3120_v24 = vunpack.i.l.bf16 %v3119_v18  ;;  %v3121_v34 = vunpack.i.h.bf16 %v3119_v18 }
 0x187   : > { %v3116_v9 = vunpack.i.h.bf16 %v3114_v38  ;;  %v3115_v27 = vunpack.i.l.bf16 %v3114_v38 }
 0x188   : > { %v1566_v39 = vsel %vm1535_vm7, %v1533_v26, %v3120_v24  ;;  %v1567_v42 = vsel %vm1535_vm7, %v1534_v41, %v3121_v34 }
 0x189   : > { %v3129_v21 = vpop.permute.xlu1 %3128  ;;  %v1564_v15 = vsel %vm1535_vm7, %v1531_v36, %v3115_v27  ;;  %v1565_v49 = vsel %vm1535_vm7, %v1532_v60, %v3116_v9 }
 0x18a   : > { %v3124_v1 = vpop.permute.xlu0 %3123  ;;  %v3131_v35 = vunpack.i.h.bf16 %v3129_v21  ;;  %v3130_v29 = vunpack.i.l.bf16 %v3129_v21 }
 0x18b   : > { %v3126_v37 = vunpack.i.h.bf16 %v3124_v1  ;;  %v3125_v51 = vunpack.i.l.bf16 %v3124_v1 }
 0x18c   : > { %v1599_v50 = vsel %vm1568_vm8, %v1566_v39, %v3130_v29  ;;  %v1600_v25 = vsel %vm1568_vm8, %v1567_v42, %v3131_v35 }
 0x18d   : > { %v3139_v30 = vpop.permute.xlu1 %3138  ;;  %v1597_v47 = vsel %vm1568_vm8, %v1564_v15, %v3125_v51  ;;  %v1598_v52 = vsel %vm1568_vm8, %v1565_v49, %v3126_v37 }
 0x18e   : > { %v3134_v61 = vpop.permute.xlu0 %3133  ;;  %v3141_v40 = vunpack.i.h.bf16 %v3139_v30  ;;  %v3140_v62 = vunpack.i.l.bf16 %v3139_v30 }
 0x18f   : > { %v3135_v4 = vunpack.i.l.bf16 %v3134_v61  ;;  %v3136_v43 = vunpack.i.h.bf16 %v3134_v61 }
 0x190   : > { %v1632_v2 = vsel %vm1601_vm9, %v1599_v50, %v3140_v62  ;;  %v1633_v48 = vsel %vm1601_vm9, %v1600_v25, %v3141_v40 }
 0x191   : > { %v3149_v58 = vpop.permute.xlu1 %3148  ;;  %v1630_v18 = vsel %vm1601_vm9, %v1597_v47, %v3135_v4  ;;  %v1631_v31 = vsel %vm1601_vm9, %v1598_v52, %v3136_v43 }
 0x192   : > { %v3151_v6 = vunpack.i.h.bf16 %v3149_v58  ;;  %v3150_v3 = vunpack.i.l.bf16 %v3149_v58  ;;  %v3144_v12 = vpop.permute.xlu0 %3143 }
 0x193   : > { %v3146_v28 = vunpack.i.h.bf16 %v3144_v12  ;;  %v3145_v59 = vunpack.i.l.bf16 %v3144_v12  ;;  %v2439_v53 = vpop.f32.mrb[0].mxu0 }
 0x194   : > { %v1839_v13 = vadd.f32 %v2439_v53, %v4307_v44  ;;  %v1830_v0 = vpop.f32.mrb[1].mxu0  ;;  %v1665_v45 = vsel %vm1634_vm10, %v1632_v2, %v3150_v3  ;;  %v1666_v5 = vsel %vm1634_vm10, %v1633_v48, %v3151_v6 }
 0x195   : > { %v3159_v38 = vpop.permute.xlu1 %3158  ;;  %v2440_v7 = vpop.f32.mrb[2].mxu0  ;;  %v1663_v21 = vsel %vm1634_vm10, %v1630_v18, %v3145_v59  ;;  %v1831_v33 = vadd.f32 %v4307_v44, %v1830_v0  ;;  %v1664_v16 = vsel %vm1634_vm10, %v1631_v31, %v3146_v28 }
 0x196   : > { %v3161_v14 = vunpack.i.h.bf16 %v3159_v38  ;;  %v1842_v22 = vadd.f32 %v2440_v7, %v4307_v44  ;;  %v3160_v55 = vunpack.i.l.bf16 %v3159_v38  ;;  %v3154_v57 = vpop.permute.xlu0 %3153  ;;  %v1833_v46 = vpop.f32.mrb[3].mxu0  ;;  %v1959_v54 = vmax.f32 %v1839_v13, 0.0 }
 0x197   : > { %v3156_v1 = vunpack.i.h.bf16 %v3154_v57  ;;  %v3155_v11 = vunpack.i.l.bf16 %v3154_v57  ;;  %v1834_v19 = vadd.f32 %v4307_v44, %v1833_v46  ;;  %v1957_v56 = vmax.f32 %v1831_v33, 0.0 }
 0x198   : > { %v1699_v63 = vsel %vm1667_vm11, %v1666_v5, %v3161_v14  ;;  %v1960_v17 = vmax.f32 %v1842_v22, 0.0  ;;  %v1698_v10 = vsel %vm1667_vm11, %v1665_v45, %v3160_v55 }
 0x199   : > { %v1715_v20 = vpack.c.bf16 %v1699_v63, %v1698_v10  ;;  %v1696_v8 = vsel %vm1667_vm11, %v1663_v21, %v3155_v11  ;;  %v1697_v23 = vsel %vm1667_vm11, %v1664_v16, %v3156_v1  ;;  %v1958_v32 = vmax.f32 %v1834_v19, 0.0 }
 0x19a   : > { %v1990_v24 = vpack.c.bf16 %v1960_v17, %v1959_v54  ;;  %v1714_v30 = vpack.c.bf16 %v1697_v23, %v1696_v8 }
 0x19b   : > { %v1989_v26 = vpack.c.bf16 %v1958_v32, %v1957_v56 }
 0x19c   : > { %2465 = vmatprep.mubr.msk.bf16.mxu0 %vm1743_vm12, %v1714_v30 }
 0x19d   : > { %2466 = vmatmul.mubr.msk.bf16.gmra.mrb[28].mxu0 %vm1743_vm12, %v1715_v20  ;;  %2471 = vmatprep.mubr.msk.bf16.mxu1 %vm1469_vm5, %v1989_v26 }
 0x19e   : > { %2472 = vmatmul.mubr.msk.bf16.vlgmr.msra.gmra.mrb[0].mxu1 %vm1469_vm5, %v1990_v24 }
 0x1b3   : > { %v2443_v41 = vpop.f32.mrb[4].mxu0 }
 0x1b4   : > { %v1855_v34 = vadd.f32 %v2443_v41, %v4307_v44  ;;  %v1846_v9 = vpop.f32.mrb[5].mxu0 }
 0x1b5   : > { %v1847_v27 = vadd.f32 %v4307_v44, %v1846_v9  ;;  %v2444_v35 = vpop.f32.mrb[6].mxu0 }
 0x1b6   : > { %v1858_v29 = vadd.f32 %v2444_v35, %v4307_v44  ;;  %v1849_v61 = vpop.f32.mrb[7].mxu0  ;;  %v1963_v60 = vmax.f32 %v1855_v34, 0.0 }
 0x1b7   : > { %v1850_v36 = vadd.f32 %v4307_v44, %v1849_v61  ;;  %v1961_v51 = vmax.f32 %v1847_v27, 0.0 }
 0x1b8   : > { %v1964_v37 = vmax.f32 %v1858_v29, 0.0 }
 0x1b9   : > { %v1962_v39 = vmax.f32 %v1850_v36, 0.0 }
 0x1ba   : > { %v1992_v40 = vpack.c.bf16 %v1964_v37, %v1963_v60 }
 0x1bb   : > { %v1991_v62 = vpack.c.bf16 %v1962_v39, %v1961_v51 }
 0x1bd   : > { %2475 = vmatprep.mubr.msk.bf16.mxu1 %vm1469_vm5, %v1991_v62 }
 0x1be   : > { %2476 = vmatmul.mubr.msk.bf16.gmra.mrb[4].mxu1 %vm1469_vm5, %v1992_v40 }
 0x1d3   : > { %v2447_v4 = vpop.f32.mrb[8].mxu0 }
 0x1d4   : > { %v1871_v58 = vadd.f32 %v2447_v4, %v4307_v44  ;;  %v1862_v42 = vpop.f32.mrb[9].mxu0 }
 0x1d5   : > { %v1863_v43 = vadd.f32 %v4307_v44, %v1862_v42  ;;  %v2448_v6 = vpop.f32.mrb[10].mxu0 }
 0x1d6   : > { %v1874_v3 = vadd.f32 %v2448_v6, %v4307_v44  ;;  %v1865_v15 = vpop.f32.mrb[11].mxu0  ;;  %v1967_v50 = vmax.f32 %v1871_v58, 0.0 }
 0x1d7   : > { %v1866_v49 = vadd.f32 %v4307_v44, %v1865_v15  ;;  %v1965_v12 = vmax.f32 %v1863_v43, 0.0 }
 0x1d8   : > { %v1968_v25 = vmax.f32 %v1874_v3, 0.0 }
 0x1d9   : > { %v1966_v47 = vmax.f32 %v1866_v49, 0.0 }
 0x1da   : > { %v1994_v52 = vpack.c.bf16 %v1968_v25, %v1967_v50  ;;  %v4374_v50 = vld [vmem:[%s4524_s4] ss:$0 sm:$0xff] }
 0x1db   : > { %v1993_v28 = vpack.c.bf16 %v1966_v47, %v1965_v12 }
 0x1dd   : > { %2479 = vmatprep.mubr.msk.bf16.mxu1 %vm1469_vm5, %v1993_v28 }
 0x1de   : > { %2480 = vmatmul.mubr.msk.bf16.gmra.mrb[8].mxu1 %vm1469_vm5, %v1994_v52 }
 0x1f3   : > { %v2451_v59 = vpop.f32.mrb[12].mxu0 }
 0x1f4   : > { %v1887_v53 = vadd.f32 %v2451_v59, %v4307_v44  ;;  %v1878_v2 = vpop.f32.mrb[13].mxu0 }
 0x1f5   : > { %v1879_v48 = vadd.f32 %v4307_v44, %v1878_v2  ;;  %v2452_v18 = vpop.f32.mrb[14].mxu0 }
 0x1f6   : > { %v1890_v13 = vadd.f32 %v2452_v18, %v4307_v44  ;;  %v1881_v0 = vpop.f32.mrb[15].mxu0  ;;  %v1971_v31 = vmax.f32 %v1887_v53, 0.0 }
 0x1f7   : > { %v1882_v38 = vadd.f32 %v4307_v44, %v1881_v0  ;;  %v1969_v5 = vmax.f32 %v1879_v48, 0.0 }
 0x1f8   : > { %v1972_v45 = vmax.f32 %v1890_v13, 0.0 }
 0x1f9   : > { %v1970_v7 = vmax.f32 %v1882_v38, 0.0 }
 0x1fa   : > { %v1996_v14 = vpack.c.bf16 %v1972_v45, %v1971_v31  ;;  %v3191_v31 = vld [vmem:[%s3344_s23 + $0x10] sm:$0xff] }
 0x1fb   : > { %v1995_v21 = vpack.c.bf16 %v1970_v7, %v1969_v5 }
 0x1fd   : > { %2483 = vmatprep.mubr.msk.bf16.mxu1 %vm1469_vm5, %v1995_v21 }
 0x1fe   : > { %2484 = vmatmul.mubr.msk.bf16.gmra.mrb[12].mxu1 %vm1469_vm5, %v1996_v14 }
 0x213   : > { %v2455_v33 = vpop.f32.mrb[16].mxu0 }
 0x214   : > { %v1903_v22 = vadd.f32 %v2455_v33, %v4307_v44  ;;  %v1894_v55 = vpop.f32.mrb[17].mxu0  ;;  %v3192_v33 = vld [vmem:[%s3344_s23] sm:$0xff] }
 0x215   : > { %v1895_v57 = vadd.f32 %v4307_v44, %v1894_v55  ;;  %v2456_v46 = vpop.f32.mrb[18].mxu0 }
 0x216   : > { %v1906_v16 = vadd.f32 %v2456_v46, %v4307_v44  ;;  %v1897_v63 = vpop.f32.mrb[19].mxu0  ;;  %v1975_v11 = vmax.f32 %v1903_v22, 0.0  ;;  %v3193_v46 = vld [vmem:[%s3344_s23 + $0x18] sm:$0xff] }
 0x217   : > { %v1898_v1 = vadd.f32 %v4307_v44, %v1897_v63  ;;  %v1973_v17 = vmax.f32 %v1895_v57, 0.0 }
 0x218   : > { %v1976_v54 = vmax.f32 %v1906_v16, 0.0 }
 0x219   : > { %v1974_v10 = vmax.f32 %v1898_v1, 0.0  ;;  %v3194_v1 = vld [vmem:[%s3344_s23 + $0x8] sm:$0xff] }
 0x21a   : > { %v1998_v19 = vpack.c.bf16 %v1976_v54, %v1975_v11 }
 0x21b   : > { %v1997_v20 = vpack.c.bf16 %v1974_v10, %v1973_v17 }
 0x21d   : > { %2487 = vmatprep.mubr.msk.bf16.mxu1 %vm1469_vm5, %v1997_v20 }
 0x21e   : > { %2488 = vmatmul.mubr.msk.bf16.gmra.mrb[16].mxu1 %vm1469_vm5, %v1998_v19 }
 0x233   : > { %v2459_v8 = vpop.f32.mrb[20].mxu0 }
 0x234   : > { %v1919_v23 = vadd.f32 %v2459_v8, %v4307_v44  ;;  %v1910_v56 = vpop.f32.mrb[21].mxu0  ;;  %v3195_v8 = vld [vmem:[%s3344_s23 + $0x30] sm:$0xff] }
 0x235   : > { %v1911_v24 = vadd.f32 %v4307_v44, %v1910_v56  ;;  %v2460_v30 = vpop.f32.mrb[22].mxu0 }
 0x236   : > { %v1922_v32 = vadd.f32 %v2460_v30, %v4307_v44  ;;  %v1913_v26 = vpop.f32.mrb[23].mxu0  ;;  %v1979_v34 = vmax.f32 %v1919_v23, 0.0  ;;  %v3196_v30 = vld [vmem:[%s3344_s23 + $0x20] sm:$0xff] }
 0x237   : > { %v1914_v41 = vadd.f32 %v4307_v44, %v1913_v26  ;;  %v1977_v27 = vmax.f32 %v1911_v24, 0.0 }
 0x238   : > { %v1980_v9 = vmax.f32 %v1922_v32, 0.0 }
 0x239   : > { %v1978_v35 = vmax.f32 %v1914_v41, 0.0  ;;  %v3197_v41 = vld [vmem:[%s3344_s23 + $0x38] sm:$0xff] }
 0x23a   : > { %v2000_v29 = vpack.c.bf16 %v1980_v9, %v1979_v34  ;;  %v3198_v9 = vld [vmem:[%s3344_s23 + $0x28] sm:$0xff] }
 0x23b   : > { %v1999_v61 = vpack.c.bf16 %v1978_v35, %v1977_v27 }
 0x23d   : > { %2491 = vmatprep.mubr.msk.bf16.mxu1 %vm1469_vm5, %v1999_v61 }
 0x23e   : > { %2492 = vmatmul.mubr.msk.bf16.gmra.mrb[20].mxu1 %vm1469_vm5, %v2000_v29 }
 0x253   : > { %v2463_v36 = vpop.f32.mrb[24].mxu0 }
 0x254   : > { %v1935_v60 = vadd.f32 %v2463_v36, %v4307_v44  ;;  %v1926_v37 = vpop.f32.mrb[25].mxu0 }
 0x255   : > { %v1927_v51 = vadd.f32 %v4307_v44, %v1926_v37  ;;  %v2464_v39 = vpop.f32.mrb[26].mxu0  ;;  %v3199_v37 = vld [vmem:[%s3344_s23 + $0x50] sm:$0xff] }
 0x256   : > { %v1938_v40 = vadd.f32 %v2464_v39, %v4307_v44  ;;  %v1929_v62 = vpop.f32.mrb[27].mxu0  ;;  %v1983_v58 = vmax.f32 %v1935_v60, 0.0 }
 0x257   : > { %v1930_v4 = vadd.f32 %v4307_v44, %v1929_v62  ;;  %v1981_v43 = vmax.f32 %v1927_v51, 0.0  ;;  %v3200_v62 = vld [vmem:[%s3344_s23 + $0x40] sm:$0xff] }
 0x258   : > { %v1984_v42 = vmax.f32 %v1938_v40, 0.0 }
 0x259   : > { %v1982_v6 = vmax.f32 %v1930_v4, 0.0 }
 0x25a   : > { %v2002_v3 = vpack.c.bf16 %v1984_v42, %v1983_v58  ;;  %v3201_v42 = vld [vmem:[%s3344_s23 + $0x58] sm:$0xff] }
 0x25b   : > { %v2001_v15 = vpack.c.bf16 %v1982_v6, %v1981_v43  ;;  %v3202_v6 = vld [vmem:[%s3344_s23 + $0x48] sm:$0xff] }
 0x25d   : > { %2495 = vmatprep.mubr.msk.bf16.mxu1 %vm1469_vm5, %v2001_v15 }
 0x25e   : > { %2496 = vmatmul.mubr.msk.bf16.gmra.mrb[24].mxu1 %vm1469_vm5, %v2002_v3 }
 0x270   : > { %v2467_v49 = vpop.f32.mrb[28].mxu0 }
 0x271   : > { %v1951_v25 = vadd.f32 %v2467_v49, %v4307_v44  ;;  %v1942_v12 = vpop.f32.mrb[29].mxu0  ;;  %v2473_v52 = vpop.f32.mrb[0].mxu1 }
 0x272   : > { %v1943_v47 = vadd.f32 %v4307_v44, %v1942_v12  ;;  %v2468_v28 = vpop.f32.mrb[30].mxu0  ;;  %v2108_v59 = vadd.f32 %v2473_v52, %v4374_v50  ;;  %v2099_v2 = vpop.f32.mrb[1].mxu1  ;;  %v3203_v52 = vld [vmem:[%s3344_s23 + $0x70] sm:$0xff] }
 0x273   : > { %v1954_v53 = vadd.f32 %v2468_v28, %v4307_v44  ;;  %v1945_v48 = vpop.f32.mrb[31].mxu0  ;;  %v2100_v18 = vadd.f32 %v4374_v50, %v2099_v2  ;;  %v2474_v0 = vpop.f32.mrb[2].mxu1  ;;  %v1987_v38 = vmax.f32 %v1951_v25, 0.0  ;;  %v3204_v2 = vld [vmem:[%s3344_s23 + $0x60] sm:$0xff] }
 0x274   : > { %v1946_v13 = vadd.f32 %v4307_v44, %v1945_v48  ;;  %v2228_v45 = vadd.f32 %v3191_v31, %v2108_v59  ;;  %v2111_v7 = vadd.f32 %v2474_v0, %v4374_v50  ;;  %v2102_v14 = vpop.f32.mrb[3].mxu1  ;;  %v1985_v21 = vmax.f32 %v1943_v47, 0.0 }
 0x275   : > { %v1988_v5 = vmax.f32 %v1954_v53, 0.0  ;;  %v2226_v22 = vadd.f32 %v3192_v33, %v2100_v18  ;;  %v2103_v57 = vadd.f32 %v4374_v50, %v2102_v14  ;;  %v3207_v33 = vld [vmem:[%s3344_s23 + $0x90] sm:$0xff] }
 0x276   : > { %v1986_v55 = vmax.f32 %v1946_v13, 0.0  ;;  %2260 = vst.msk [vmem:[%s4385_s25 + $0x10] sm:$0xff] %vm258_vm0, %v2228_v45  ;;  %v2229_v16 = vadd.f32 %v3193_v46, %v2111_v7  ;;  %v3205_v13 = vld [vmem:[%s3344_s23 + $0x78] sm:$0xff] }
 0x277   : > { %v2004_v44 = vpack.c.bf16 %v1988_v5, %v1987_v38  ;;  %2258 = vst.msk [vmem:[%s4385_s25] sm:$0xff] %vm258_vm0, %v2226_v22  ;;  %v2227_v11 = vadd.f32 %v3194_v1, %v2103_v57  ;;  %v3206_v38 = vld [vmem:[%s3344_s23 + $0x68] sm:$0xff] }
 0x278   : > { %v2003_v63 = vpack.c.bf16 %v1986_v55, %v1985_v21  ;;  %2261 = vst.msk [vmem:[%s4385_s25 + $0x18] sm:$0xff] %vm258_vm0, %v2229_v16 }
 0x279   : > { %2259 = vst.msk [vmem:[%s4385_s25 + $0x8] sm:$0xff] %vm258_vm0, %v2227_v11  ;;  %v3210_v11 = vld [vmem:[%s3344_s23 + $0x88] sm:$0xff] }
 0x27a   : > { %2499 = vmatprep.mubr.msk.bf16.mxu1 %vm1469_vm5, %v2003_v63  ;;  %v3209_v63 = vld [vmem:[%s3344_s23 + $0x98] sm:$0xff] }
 0x27b   : > { %2500 = vmatmul.mubr.msk.bf16.gmra.mrb[28].mxu1 %vm1469_vm5, %v2004_v44  ;;  %v3208_v44 = vld [vmem:[%s3344_s23 + $0x80] sm:$0xff] }
 0x291   : > { %v2477_v54 = vpop.f32.mrb[4].mxu1 }
 0x292   : > { %v2124_v17 = vadd.f32 %v2477_v54, %v4374_v50  ;;  %v2115_v10 = vpop.f32.mrb[5].mxu1 }
 0x293   : > { %v2116_v19 = vadd.f32 %v4374_v50, %v2115_v10  ;;  %v2478_v20 = vpop.f32.mrb[6].mxu1 }
 0x294   : > { %v2232_v23 = vadd.f32 %v3195_v8, %v2124_v17  ;;  %v2127_v56 = vadd.f32 %v2478_v20, %v4374_v50  ;;  %v2118_v24 = vpop.f32.mrb[7].mxu1 }
 0x295   : > { %v2230_v32 = vadd.f32 %v3196_v30, %v2116_v19  ;;  %v2119_v26 = vadd.f32 %v4374_v50, %v2118_v24 }
 0x296   : > { %2264 = vst.msk [vmem:[%s4385_s25 + $0x30] sm:$0xff] %vm258_vm0, %v2232_v23  ;;  %v2233_v34 = vadd.f32 %v3197_v41, %v2127_v56  ;;  %v3211_v23 = vld [vmem:[%s3344_s23 + $0xb0] sm:$0xff] }
 0x297   : > { %2262 = vst.msk [vmem:[%s4385_s25 + $0x20] sm:$0xff] %vm258_vm0, %v2230_v32  ;;  %v2231_v27 = vadd.f32 %v3198_v9, %v2119_v26  ;;  %v3212_v32 = vld [vmem:[%s3344_s23 + $0xa0] sm:$0xff] }
 0x298   : > { %2265 = vst.msk [vmem:[%s4385_s25 + $0x38] sm:$0xff] %vm258_vm0, %v2233_v34  ;;  %v3213_v34 = vld [vmem:[%s3344_s23 + $0xb8] sm:$0xff] }
 0x299   : > { %2263 = vst.msk [vmem:[%s4385_s25 + $0x28] sm:$0xff] %vm258_vm0, %v2231_v27  ;;  %v3214_v27 = vld [vmem:[%s3344_s23 + $0xa8] sm:$0xff] }
 0x2b1   : > { %v2481_v35 = vpop.f32.mrb[8].mxu1 }
 0x2b2   : > { %v2140_v29 = vadd.f32 %v2481_v35, %v4374_v50  ;;  %v2131_v61 = vpop.f32.mrb[9].mxu1 }
 0x2b3   : > { %v2132_v36 = vadd.f32 %v4374_v50, %v2131_v61  ;;  %v2482_v60 = vpop.f32.mrb[10].mxu1 }
 0x2b4   : > { %v2236_v51 = vadd.f32 %v3199_v37, %v2140_v29  ;;  %v2143_v39 = vadd.f32 %v2482_v60, %v4374_v50  ;;  %v2134_v40 = vpop.f32.mrb[11].mxu1 }
 0x2b5   : > { %v2234_v4 = vadd.f32 %v3200_v62, %v2132_v36  ;;  %v2135_v58 = vadd.f32 %v4374_v50, %v2134_v40 }
 0x2b6   : > { %2268 = vst.msk [vmem:[%s4385_s25 + $0x50] sm:$0xff] %vm258_vm0, %v2236_v51  ;;  %v2237_v43 = vadd.f32 %v3201_v42, %v2143_v39  ;;  %v3215_v51 = vld [vmem:[%s3344_s23 + $0xd0] sm:$0xff] }
 0x2b7   : > { %2266 = vst.msk [vmem:[%s4385_s25 + $0x40] sm:$0xff] %vm258_vm0, %v2234_v4  ;;  %v2235_v3 = vadd.f32 %v3202_v6, %v2135_v58  ;;  %v3216_v4 = vld [vmem:[%s3344_s23 + $0xc0] sm:$0xff] }
 0x2b8   : > { %2269 = vst.msk [vmem:[%s4385_s25 + $0x58] sm:$0xff] %vm258_vm0, %v2237_v43  ;;  %v3217_v43 = vld [vmem:[%s3344_s23 + $0xd8] sm:$0xff] }
 0x2b9   : > { %2267 = vst.msk [vmem:[%s4385_s25 + $0x48] sm:$0xff] %vm258_vm0, %v2235_v3  ;;  %v3218_v3 = vld [vmem:[%s3344_s23 + $0xc8] sm:$0xff] }
 0x2d1   : > { %v2485_v15 = vpop.f32.mrb[12].mxu1 }
 0x2d2   : > { %v2156_v49 = vadd.f32 %v2485_v15, %v4374_v50  ;;  %v2147_v25 = vpop.f32.mrb[13].mxu1 }
 0x2d3   : > { %v2148_v12 = vadd.f32 %v4374_v50, %v2147_v25  ;;  %v2486_v47 = vpop.f32.mrb[14].mxu1 }
 0x2d4   : > { %v2240_v28 = vadd.f32 %v3203_v52, %v2156_v49  ;;  %v2159_v59 = vadd.f32 %v2486_v47, %v4374_v50  ;;  %v2150_v53 = vpop.f32.mrb[15].mxu1 }
 0x2d5   : > { %v2238_v48 = vadd.f32 %v3204_v2, %v2148_v12  ;;  %v2151_v18 = vadd.f32 %v4374_v50, %v2150_v53 }
 0x2d6   : > { %2272 = vst.msk [vmem:[%s4385_s25 + $0x70] sm:$0xff] %vm258_vm0, %v2240_v28  ;;  %v2241_v0 = vadd.f32 %v3205_v13, %v2159_v59  ;;  %v3219_v28 = vld [vmem:[%s3344_s23 + $0xf0] sm:$0xff] }
 0x2d7   : > { %2270 = vst.msk [vmem:[%s4385_s25 + $0x60] sm:$0xff] %vm258_vm0, %v2238_v48  ;;  %v2239_v31 = vadd.f32 %v3206_v38, %v2151_v18  ;;  %v3220_v48 = vld [vmem:[%s3344_s23 + $0xe0] sm:$0xff] }
 0x2d8   : > { %2273 = vst.msk [vmem:[%s4385_s25 + $0x78] sm:$0xff] %vm258_vm0, %v2241_v0  ;;  %v3221_v0 = vld [vmem:[%s3344_s23 + $0xf8] sm:$0xff] }
 0x2d9   : > { %2271 = vst.msk [vmem:[%s4385_s25 + $0x68] sm:$0xff] %vm258_vm0, %v2239_v31  ;;  %v3222_v31 = vld [vmem:[%s3344_s23 + $0xe8] sm:$0xff] }
 0x2f1   : > { %v2489_v45 = vpop.f32.mrb[16].mxu1 }
 0x2f2   : > { %v2172_v5 = vadd.f32 %v2489_v45, %v4374_v50  ;;  %v2163_v7 = vpop.f32.mrb[17].mxu1 }
 0x2f3   : > { %v2164_v14 = vadd.f32 %v4374_v50, %v2163_v7  ;;  %v2490_v21 = vpop.f32.mrb[18].mxu1 }
 0x2f4   : > { %v2244_v22 = vadd.f32 %v3207_v33, %v2172_v5  ;;  %v2175_v55 = vadd.f32 %v2490_v21, %v4374_v50  ;;  %v2166_v57 = vpop.f32.mrb[19].mxu1 }
 0x2f5   : > { %v2242_v46 = vadd.f32 %v3208_v44, %v2164_v14  ;;  %v2167_v16 = vadd.f32 %v4374_v50, %v2166_v57 }
 0x2f6   : > { %2276 = vst.msk [vmem:[%s4385_s25 + $0x90] sm:$0xff] %vm258_vm0, %v2244_v22  ;;  %v2245_v1 = vadd.f32 %v3209_v63, %v2175_v55 }
 0x2f7   : > { %2274 = vst.msk [vmem:[%s4385_s25 + $0x80] sm:$0xff] %vm258_vm0, %v2242_v46  ;;  %v2243_v54 = vadd.f32 %v3210_v11, %v2167_v16 }
 0x2f8   : > { %2277 = vst.msk [vmem:[%s4385_s25 + $0x98] sm:$0xff] %vm258_vm0, %v2245_v1 }
 0x2f9   : > { %2275 = vst.msk [vmem:[%s4385_s25 + $0x88] sm:$0xff] %vm258_vm0, %v2243_v54 }
 0x311   : > { %v2493_v17 = vpop.f32.mrb[20].mxu1 }
 0x312   : > { %v2188_v10 = vadd.f32 %v2493_v17, %v4374_v50  ;;  %v2179_v19 = vpop.f32.mrb[21].mxu1 }
 0x313   : > { %v2180_v20 = vadd.f32 %v4374_v50, %v2179_v19  ;;  %v2494_v8 = vpop.f32.mrb[22].mxu1 }
 0x314   : > { %v2248_v56 = vadd.f32 %v3211_v23, %v2188_v10  ;;  %v2191_v24 = vadd.f32 %v2494_v8, %v4374_v50  ;;  %v2182_v30 = vpop.f32.mrb[23].mxu1 }
 0x315   : > { %v2246_v26 = vadd.f32 %v3212_v32, %v2180_v20  ;;  %v2183_v41 = vadd.f32 %v4374_v50, %v2182_v30 }
 0x316   : > { %2280 = vst.msk [vmem:[%s4385_s25 + $0xb0] sm:$0xff] %vm258_vm0, %v2248_v56  ;;  %v2249_v9 = vadd.f32 %v3213_v34, %v2191_v24 }
 0x317   : > { %2278 = vst.msk [vmem:[%s4385_s25 + $0xa0] sm:$0xff] %vm258_vm0, %v2246_v26  ;;  %v2247_v35 = vadd.f32 %v3214_v27, %v2183_v41 }
 0x318   : > { %2281 = vst.msk [vmem:[%s4385_s25 + $0xb8] sm:$0xff] %vm258_vm0, %v2249_v9 }
 0x319   : > { %2279 = vst.msk [vmem:[%s4385_s25 + $0xa8] sm:$0xff] %vm258_vm0, %v2247_v35 }
 0x331   : > { %v2497_v29 = vpop.f32.mrb[24].mxu1 }
 0x332   : > { %v2204_v61 = vadd.f32 %v2497_v29, %v4374_v50  ;;  %v2195_v36 = vpop.f32.mrb[25].mxu1 }
 0x333   : > { %v2196_v60 = vadd.f32 %v4374_v50, %v2195_v36  ;;  %v2498_v37 = vpop.f32.mrb[26].mxu1 }
 0x334   : > { %v2252_v39 = vadd.f32 %v3215_v51, %v2204_v61  ;;  %v2207_v40 = vadd.f32 %v2498_v37, %v4374_v50  ;;  %v2198_v62 = vpop.f32.mrb[27].mxu1 }
 0x335   : > { %v2250_v58 = vadd.f32 %v3216_v4, %v2196_v60  ;;  %v2199_v42 = vadd.f32 %v4374_v50, %v2198_v62 }
 0x336   : > { %2284 = vst.msk [vmem:[%s4385_s25 + $0xd0] sm:$0xff] %vm258_vm0, %v2252_v39  ;;  %v2253_v6 = vadd.f32 %v3217_v43, %v2207_v40 }
 0x337   : > { %2282 = vst.msk [vmem:[%s4385_s25 + $0xc0] sm:$0xff] %vm258_vm0, %v2250_v58  ;;  %v2251_v15 = vadd.f32 %v3218_v3, %v2199_v42 }
 0x338   : > { %2285 = vst.msk [vmem:[%s4385_s25 + $0xd8] sm:$0xff] %vm258_vm0, %v2253_v6 }
 0x339   : > { %2283 = vst.msk [vmem:[%s4385_s25 + $0xc8] sm:$0xff] %vm258_vm0, %v2251_v15 }
 0x34e   : > { %v2501_v49 = vpop.f32.mrb[28].mxu1 }
 0x34f   : > { %v2220_v25 = vadd.f32 %v2501_v49, %v4374_v50  ;;  %v2211_v12 = vpop.f32.mrb[29].mxu1 }
 0x350   : > { %v2212_v47 = vadd.f32 %v4374_v50, %v2211_v12  ;;  %v2502_v52 = vpop.f32.mrb[30].mxu1 }
 0x351   : > { %v2256_v59 = vadd.f32 %v3219_v28, %v2220_v25  ;;  %v2223_v53 = vadd.f32 %v2502_v52, %v4374_v50  ;;  %v2214_v2 = vpop.f32.mrb[31].mxu1 }
 0x352   : > { %v2254_v18 = vadd.f32 %v3220_v48, %v2212_v47  ;;  %v2215_v13 = vadd.f32 %v4374_v50, %v2214_v2 }
 0x353   : > { %2288 = vst.msk [vmem:[%s4385_s25 + $0xf0] sm:$0xff] %vm258_vm0, %v2256_v59  ;;  %v2257_v38 = vadd.f32 %v3221_v0, %v2223_v53 }
 0x354   : > { %2286 = vst.msk [vmem:[%s4385_s25 + $0xe0] sm:$0xff] %vm258_vm0, %v2254_v18  ;;  %v2255_v45 = vadd.f32 %v3222_v31, %v2215_v13 }
 0x355   : > { %2289 = vst.msk [vmem:[%s4385_s25 + $0xf8] sm:$0xff] %vm258_vm0, %v2257_v38 }
 0x356   : > { %2287 = vst.msk [vmem:[%s4385_s25 + $0xe8] sm:$0xff] %vm258_vm0, %v2255_v45 }
 0x357 PF: > { %s15_s18 = sadd.s32 1, %s3229_s18  }
 0x358   : > { %p12_p4 = scmp.ge.s32.totalorder %s15_s18, 4  }
 0x35a   :  { %14 = sbr.rel (!%p12_p4) target bundleno = 1 (0x1), region = 71 }

</bundles_post_ra>
